<compile_context>
chip_gen: v7x
topology: tpu7x:2x2x1
jax: 0.10.0
libtpu: 0.0.40
codegen_flags: <defaults>
</compile_context>

<pallas_src>
import functools

import jax
import jax.numpy as jnp
import numpy as np
from jax.experimental import pallas as pl
from jax.experimental.pallas import tpu as pltpu

DEPTH = 3


def autoregressive_angle_kernel(
    size,
    # inputs
    x_ref, noise_ref, h0_ref, h1_ref, h2_ref,
    wih0, bih0, whh0, bhh0,
    wih1, bih1, whh1, bhh1,
    wih2, bih2, whh2, bhh2,
    w_head, b_head,
    # outputs
    out_ref, s0_ref, s1_ref, s2_ref,
):
    """One batch-tile of the full forward pass (3 GRU cells + sampled head)."""
    compute = jnp.bfloat16

    def matmul(a, w_slice):
        return jnp.dot(a, w_slice, preferred_element_type=jnp.float32)

    out = x_ref[...].astype(compute)
    layers = (
        (h0_ref, wih0, bih0, whh0, bhh0, s0_ref),
        (h1_ref, wih1, bih1, whh1, bhh1, s1_ref),
        (h2_ref, wih2, bih2, whh2, bhh2, s2_ref),
    )
    for h_ref, wih, bih, whh, bhh, s_ref in layers:
        h_f32 = h_ref[...]
        h_bf = h_f32.astype(compute)

        # Per-gate matmuls (r, z, n): weight slices land on 128-lane
        # boundaries (size % 128 == 0) so slicing is free, and only
        # [tile_b, size] f32 temporaries are live at a time.
        def gate(k):
            lo, hi = k * size, (k + 1) * size
            gi = matmul(out, wih[:, lo:hi]) + bih[:, lo:hi]
            gh = matmul(h_bf, whh[:, lo:hi]) + bhh[:, lo:hi]
            return gi, gh

        gi_r, gh_r = gate(0)
        r = jax.nn.sigmoid(gi_r + gh_r)
        gi_z, gh_z = gate(1)
        z = jax.nn.sigmoid(gi_z + gh_z)
        gi_n, gh_n = gate(2)
        n = jnp.tanh(gi_n + r * gh_n)

        h_new = (1.0 - z) * n + z * h_f32          # exact nn.GRUCell update
        s_ref[...] = h_new
        out = h_new.astype(compute)

    # Fused mean/logvar head: a single [size, 2*size] matmul, then
    # lane-aligned slices.
    head = matmul(out, w_head[...]) + b_head[...]
    mean = head[:, :size]
    std = jnp.exp(head[:, size:2 * size] * 0.5)
    out_ref[...] = noise_ref[...] * std + mean


def _choose_tile_b(B):
    """Largest multiple-of-8 divisor of B, capped at 64 (vreg pressure),
    preferring >= 2 grid steps so v7x's second TensorCore gets work."""
    best = None
    for t in range(8, min(B, 64) + 1, 8):
        if B % t == 0:
            best = t
    if best is None:
        return B                      # small / ragged batch: one full-B block
    if best == B and B >= 16 and (B // 2) % 8 == 0:
        best = B // 2                 # give the parallel axis >= 2 steps
    return best


def autoregressive_angle(inputs, noise, params, state=None, *, tile_b=None,
                         param_dtype=jnp.bfloat16):
    """Pallas-backed forward.  Returns (sample, [state_0, state_1, state_2])."""
    B, S = inputs.shape
    assert S % 128 == 0, "feature size must be a multiple of 128 (lane width)"
    if tile_b is None:
        tile_b = _choose_tile_b(B)
    assert B % tile_b == 0 and (tile_b == B or tile_b % 8 == 0)
    if state is None:
        state = [jnp.zeros((B, S), jnp.float32) for _ in range(DEPTH)]

    act_spec = pl.BlockSpec((tile_b, S), lambda i: (i, 0))

    def full_spec(shape):
        # Constant index_map: Pallas fetches these blocks once and reuses them
        # across all grid steps (no per-step re-DMA).
        return pl.BlockSpec(shape, lambda i: (0, 0))

    def w(a):  # bf16 weights: half the HBM traffic, native MXU rate
        return a.astype(param_dtype)

    flat_params = []
    in_specs = [act_spec, act_spec] + [act_spec] * DEPTH
    for p in params["gru"]:
        flat_params += [w(p["w_ih"]), p["b_ih"], w(p["w_hh"]), p["b_hh"]]
        in_specs += [full_spec((S, 3 * S)), full_spec((1, 3 * S)),
                     full_spec((S, 3 * S)), full_spec((1, 3 * S))]

    # Fuse the mean and logvar heads into one matmul.
    w_head = jnp.concatenate([params["mean"]["w"], params["logvar"]["w"]], axis=1)
    b_head = jnp.concatenate([params["mean"]["b"], params["logvar"]["b"]], axis=1)
    flat_params += [w(w_head), b_head]
    in_specs += [full_spec((S, 2 * S)), full_spec((1, 2 * S))]

    out_shape = [jax.ShapeDtypeStruct((B, S), jnp.float32)] * (1 + DEPTH)
    out_specs = [act_spec] * (1 + DEPTH)

    kernel = functools.partial(autoregressive_angle_kernel, S)
    results = pl.pallas_call(
        kernel,
        grid=(B // tile_b,),
        in_specs=in_specs,
        out_specs=out_specs,
        out_shape=out_shape,
        # h0/h1/h2 are consumed exactly once and overwritten by s0/s1/s2:
        # alias them so no fresh HBM state buffers are allocated per step.
        input_output_aliases={2: 1, 3: 2, 4: 3},
        compiler_params=pltpu.CompilerParams(
            dimension_semantics=("parallel",)),
    )(inputs, noise, *state, *flat_params)

    # TODO(synk): for a true autoregressive loop (many calls, same weights), a
    # persistent-weight / cross-call-prefetch variant would avoid re-streaming
    # the weights from HBM every step.
    return results[0], list(results[1:])


def reference(inputs, noise, params, state=None, param_dtype=jnp.bfloat16):
    """Pure-JAX reference mirroring the PyTorch forward (same bf16 weight cast
    as the kernel so the comparison is apples-to-apples)."""
    B, S = inputs.shape
    if state is None:
        state = [jnp.zeros((B, S), jnp.float32) for _ in range(DEPTH)]

    def mm(a, w_mat):
        return jnp.dot(a.astype(param_dtype), w_mat.astype(param_dtype),
                       preferred_element_type=jnp.float32)

    out = inputs
    new_state = []
    for h, p in zip(state, params["gru"]):
        gi = mm(out, p["w_ih"]) + p["b_ih"]
        gh = mm(h, p["w_hh"]) + p["b_hh"]
        r = jax.nn.sigmoid(gi[:, :S] + gh[:, :S])
        z = jax.nn.sigmoid(gi[:, S:2 * S] + gh[:, S:2 * S])
        n = jnp.tanh(gi[:, 2 * S:] + r * gh[:, 2 * S:])
        h = (1.0 - z) * n + z * h
        new_state.append(h)
        out = h
    mean = mm(out, params["mean"]["w"]) + params["mean"]["b"]
    std = jnp.exp((mm(out, params["logvar"]["w"]) + params["logvar"]["b"]) * 0.5)
    return noise * std + mean, new_state


def init_params(key, size):
    """Deterministic parameter init (PyTorch-style uniform(-1/sqrt(S), 1/sqrt(S)))."""
    bound = 1.0 / np.sqrt(size)
    keys = jax.random.split(key, 4 * DEPTH + 4)
    ki = iter(keys)

    def u(k, shape):
        return jax.random.uniform(k, shape, jnp.float32, -bound, bound)

    gru = []
    for _ in range(DEPTH):
        gru.append(dict(
            w_ih=u(next(ki), (size, 3 * size)),   # transposed vs torch (3S, S)
            b_ih=u(next(ki), (1, 3 * size)),
            w_hh=u(next(ki), (size, 3 * size)),
            b_hh=u(next(ki), (1, 3 * size)),
        ))
    mean = dict(w=u(next(ki), (size, size)), b=u(next(ki), (1, size)))
    logvar = dict(w=u(next(ki), (size, size)), b=u(next(ki), (1, size)))
    return dict(gru=gru, mean=mean, logvar=logvar)


if __name__ == "__main__":
    B, S = 16, 128  # batch, feature size ("size" of the module)

    key = jax.random.PRNGKey(0)
    k_param, k_x, k_noise = jax.random.split(key, 3)

    params = init_params(k_param, S)
    x = jax.random.normal(k_x, (B, S), jnp.float32)
    noise = jax.random.normal(k_noise, (B, S), jnp.float32)

    out, new_state = autoregressive_angle(x, noise, params)
    out = jax.block_until_ready(out)
    new_state = [jax.block_until_ready(s) for s in new_state]

    ref_out, ref_state = reference(x, noise, params)
    assert np.allclose(np.asarray(out), np.asarray(ref_out),
                       rtol=1e-3, atol=1e-3)
    for s, rs in zip(new_state, ref_state):
        assert np.allclose(np.asarray(s), np.asarray(rs),
                           rtol=1e-3, atol=1e-3)

    print("KERNEL_OK")
</pallas_src>

<mosaic_0001>
module attributes {stable_mosaic.version = 11 : i64} {
  func.func @autoregressive_angle_kernel(%arg0: i32, %arg1: memref<8x128xf32, #tpu.memory_space<vmem>>, %arg2: memref<8x128xf32, #tpu.memory_space<vmem>>, %arg3: memref<8x128xf32, #tpu.memory_space<vmem>>, %arg4: memref<8x128xf32, #tpu.memory_space<vmem>>, %arg5: memref<8x128xf32, #tpu.memory_space<vmem>>, %arg6: memref<128x384xbf16, #tpu.memory_space<vmem>>, %arg7: memref<1x384xf32, #tpu.memory_space<vmem>>, %arg8: memref<128x384xbf16, #tpu.memory_space<vmem>>, %arg9: memref<1x384xf32, #tpu.memory_space<vmem>>, %arg10: memref<128x384xbf16, #tpu.memory_space<vmem>>, %arg11: memref<1x384xf32, #tpu.memory_space<vmem>>, %arg12: memref<128x384xbf16, #tpu.memory_space<vmem>>, %arg13: memref<1x384xf32, #tpu.memory_space<vmem>>, %arg14: memref<128x384xbf16, #tpu.memory_space<vmem>>, %arg15: memref<1x384xf32, #tpu.memory_space<vmem>>, %arg16: memref<128x384xbf16, #tpu.memory_space<vmem>>, %arg17: memref<1x384xf32, #tpu.memory_space<vmem>>, %arg18: memref<128x256xbf16, #tpu.memory_space<vmem>>, %arg19: memref<1x256xf32, #tpu.memory_space<vmem>>, %arg20: memref<8x128xf32, #tpu.memory_space<vmem>>, %arg21: memref<8x128xf32, #tpu.memory_space<vmem>>, %arg22: memref<8x128xf32, #tpu.memory_space<vmem>>, %arg23: memref<8x128xf32, #tpu.memory_space<vmem>>) attributes {dimension_semantics = [#tpu.dimension_semantics<parallel>], iteration_bounds = array<i64: 2>, scalar_prefetch = 0 : i64, scratch_operands = 0 : i64, tpu.core_type = #tpu.core_type<tc>, window_params = [{transform_indices = @transform_0, window_bounds = array<i64: 8, 128>}, {transform_indices = @transform_1, window_bounds = array<i64: 8, 128>}, {transform_indices = @transform_2, window_bounds = array<i64: 8, 128>}, {transform_indices = @transform_3, window_bounds = array<i64: 8, 128>}, {transform_indices = @transform_4, window_bounds = array<i64: 8, 128>}, {pipeline_mode = #tpu.pipeline_mode<synchronous>, transform_indices = @transform_5, window_bounds = array<i64: 128, 384>}, {pipeline_mode = #tpu.pipeline_mode<synchronous>, transform_indices = @transform_6, window_bounds = array<i64: 1, 384>}, {pipeline_mode = #tpu.pipeline_mode<synchronous>, transform_indices = @transform_7, window_bounds = array<i64: 128, 384>}, {pipeline_mode = #tpu.pipeline_mode<synchronous>, transform_indices = @transform_8, window_bounds = array<i64: 1, 384>}, {pipeline_mode = #tpu.pipeline_mode<synchronous>, transform_indices = @transform_9, window_bounds = array<i64: 128, 384>}, {pipeline_mode = #tpu.pipeline_mode<synchronous>, transform_indices = @transform_10, window_bounds = array<i64: 1, 384>}, {pipeline_mode = #tpu.pipeline_mode<synchronous>, transform_indices = @transform_11, window_bounds = array<i64: 128, 384>}, {pipeline_mode = #tpu.pipeline_mode<synchronous>, transform_indices = @transform_12, window_bounds = array<i64: 1, 384>}, {pipeline_mode = #tpu.pipeline_mode<synchronous>, transform_indices = @transform_13, window_bounds = array<i64: 128, 384>}, {pipeline_mode = #tpu.pipeline_mode<synchronous>, transform_indices = @transform_14, window_bounds = array<i64: 1, 384>}, {pipeline_mode = #tpu.pipeline_mode<synchronous>, transform_indices = @transform_15, window_bounds = array<i64: 128, 384>}, {pipeline_mode = #tpu.pipeline_mode<synchronous>, transform_indices = @transform_16, window_bounds = array<i64: 1, 384>}, {pipeline_mode = #tpu.pipeline_mode<synchronous>, transform_indices = @transform_17, window_bounds = array<i64: 128, 256>}, {pipeline_mode = #tpu.pipeline_mode<synchronous>, transform_indices = @transform_18, window_bounds = array<i64: 1, 256>}, {transform_indices = @transform_19, window_bounds = array<i64: 8, 128>}, {transform_indices = @transform_20, window_bounds = array<i64: 8, 128>}, {transform_indices = @transform_21, window_bounds = array<i64: 8, 128>}, {transform_indices = @transform_22, window_bounds = array<i64: 8, 128>}]} {
    %c0 = arith.constant 0 : index
    %c0_0 = arith.constant 0 : index
    %0 = vector.load %arg1[%c0, %c0_0] : memref<8x128xf32, #tpu.memory_space<vmem>>, vector<8x128xf32>
    %1 = arith.truncf %0 : vector<8x128xf32> to vector<8x128xbf16>
    %c0_1 = arith.constant 0 : index
    %c0_2 = arith.constant 0 : index
    %2 = vector.load %arg3[%c0_1, %c0_2] : memref<8x128xf32, #tpu.memory_space<vmem>>, vector<8x128xf32>
    %3 = arith.truncf %2 : vector<8x128xf32> to vector<8x128xbf16>
    %c0_3 = arith.constant 0 : index
    %c0_4 = arith.constant 0 : index
    %4 = vector.load %arg6[%c0_3, %c0_4] : memref<128x384xbf16, #tpu.memory_space<vmem>>, vector<128x128xbf16>
    %cst = arith.constant dense<0.000000e+00> : vector<8x128xf32>
    %5 = tpu.matmul %1, %4, %cst {dimension_numbers = #tpu.dot_dimension_numbers<[1], [0], [0], [1], [0, 0, 1, 1], [], []>} : vector<8x128xbf16>, vector<128x128xbf16>, vector<8x128xf32> -> vector<8x128xf32>
    %c0_5 = arith.constant 0 : index
    %c0_6 = arith.constant 0 : index
    %6 = vector.load %arg7[%c0_5, %c0_6] : memref<1x384xf32, #tpu.memory_space<vmem>>, vector<1x128xf32>
    %7 = vector.broadcast %6 : vector<1x128xf32> to vector<8x128xf32>
    %8 = arith.addf %5, %7 : vector<8x128xf32>
    %c0_7 = arith.constant 0 : index
    %c0_8 = arith.constant 0 : index
    %9 = vector.load %arg8[%c0_7, %c0_8] : memref<128x384xbf16, #tpu.memory_space<vmem>>, vector<128x128xbf16>
    %cst_9 = arith.constant dense<0.000000e+00> : vector<8x128xf32>
    %10 = tpu.matmul %3, %9, %cst_9 {dimension_numbers = #tpu.dot_dimension_numbers<[1], [0], [0], [1], [0, 0, 1, 1], [], []>} : vector<8x128xbf16>, vector<128x128xbf16>, vector<8x128xf32> -> vector<8x128xf32>
    %c0_10 = arith.constant 0 : index
    %c0_11 = arith.constant 0 : index
    %11 = vector.load %arg9[%c0_10, %c0_11] : memref<1x384xf32, #tpu.memory_space<vmem>>, vector<1x128xf32>
    %12 = vector.broadcast %11 : vector<1x128xf32> to vector<8x128xf32>
    %13 = arith.addf %10, %12 : vector<8x128xf32>
    %14 = arith.addf %8, %13 : vector<8x128xf32>
    %15 = arith.negf %14 : vector<8x128xf32>
    %16 = math.exp %15 : vector<8x128xf32>
    %cst_12 = arith.constant 1.000000e+00 : f32
    %17 = vector.broadcast %cst_12 : f32 to vector<8x128xf32>
    %18 = arith.addf %17, %16 : vector<8x128xf32>
    %19 = arith.divf %17, %18 : vector<8x128xf32>
    %c0_13 = arith.constant 0 : index
    %c128 = arith.constant 128 : index
    %20 = vector.load %arg6[%c0_13, %c128] : memref<128x384xbf16, #tpu.memory_space<vmem>>, vector<128x128xbf16>
    %cst_14 = arith.constant dense<0.000000e+00> : vector<8x128xf32>
    %21 = tpu.matmul %1, %20, %cst_14 {dimension_numbers = #tpu.dot_dimension_numbers<[1], [0], [0], [1], [0, 0, 1, 1], [], []>} : vector<8x128xbf16>, vector<128x128xbf16>, vector<8x128xf32> -> vector<8x128xf32>
    %c0_15 = arith.constant 0 : index
    %c128_16 = arith.constant 128 : index
    %22 = vector.load %arg7[%c0_15, %c128_16] : memref<1x384xf32, #tpu.memory_space<vmem>>, vector<1x128xf32>
    %23 = vector.broadcast %22 : vector<1x128xf32> to vector<8x128xf32>
    %24 = arith.addf %21, %23 : vector<8x128xf32>
    %c0_17 = arith.constant 0 : index
    %c128_18 = arith.constant 128 : index
    %25 = vector.load %arg8[%c0_17, %c128_18] : memref<128x384xbf16, #tpu.memory_space<vmem>>, vector<128x128xbf16>
    %cst_19 = arith.constant dense<0.000000e+00> : vector<8x128xf32>
    %26 = tpu.matmul %3, %25, %cst_19 {dimension_numbers = #tpu.dot_dimension_numbers<[1], [0], [0], [1], [0, 0, 1, 1], [], []>} : vector<8x128xbf16>, vector<128x128xbf16>, vector<8x128xf32> -> vector<8x128xf32>
    %c0_20 = arith.constant 0 : index
    %c128_21 = arith.constant 128 : index
    %27 = vector.load %arg9[%c0_20, %c128_21] : memref<1x384xf32, #tpu.memory_space<vmem>>, vector<1x128xf32>
    %28 = vector.broadcast %27 : vector<1x128xf32> to vector<8x128xf32>
    %29 = arith.addf %26, %28 : vector<8x128xf32>
    %30 = arith.addf %24, %29 : vector<8x128xf32>
    %31 = arith.negf %30 : vector<8x128xf32>
    %32 = math.exp %31 : vector<8x128xf32>
    %cst_22 = arith.constant 1.000000e+00 : f32
    %33 = vector.broadcast %cst_22 : f32 to vector<8x128xf32>
    %34 = arith.addf %33, %32 : vector<8x128xf32>
    %35 = arith.divf %33, %34 : vector<8x128xf32>
    %c0_23 = arith.constant 0 : index
    %c256 = arith.constant 256 : index
    %36 = vector.load %arg6[%c0_23, %c256] : memref<128x384xbf16, #tpu.memory_space<vmem>>, vector<128x128xbf16>
    %cst_24 = arith.constant dense<0.000000e+00> : vector<8x128xf32>
    %37 = tpu.matmul %1, %36, %cst_24 {dimension_numbers = #tpu.dot_dimension_numbers<[1], [0], [0], [1], [0, 0, 1, 1], [], []>} : vector<8x128xbf16>, vector<128x128xbf16>, vector<8x128xf32> -> vector<8x128xf32>
    %c0_25 = arith.constant 0 : index
    %c256_26 = arith.constant 256 : index
    %38 = vector.load %arg7[%c0_25, %c256_26] : memref<1x384xf32, #tpu.memory_space<vmem>>, vector<1x128xf32>
    %39 = vector.broadcast %38 : vector<1x128xf32> to vector<8x128xf32>
    %40 = arith.addf %37, %39 : vector<8x128xf32>
    %c0_27 = arith.constant 0 : index
    %c256_28 = arith.constant 256 : index
    %41 = vector.load %arg8[%c0_27, %c256_28] : memref<128x384xbf16, #tpu.memory_space<vmem>>, vector<128x128xbf16>
    %cst_29 = arith.constant dense<0.000000e+00> : vector<8x128xf32>
    %42 = tpu.matmul %3, %41, %cst_29 {dimension_numbers = #tpu.dot_dimension_numbers<[1], [0], [0], [1], [0, 0, 1, 1], [], []>} : vector<8x128xbf16>, vector<128x128xbf16>, vector<8x128xf32> -> vector<8x128xf32>
    %c0_30 = arith.constant 0 : index
    %c256_31 = arith.constant 256 : index
    %43 = vector.load %arg9[%c0_30, %c256_31] : memref<1x384xf32, #tpu.memory_space<vmem>>, vector<1x128xf32>
    %44 = vector.broadcast %43 : vector<1x128xf32> to vector<8x128xf32>
    %45 = arith.addf %42, %44 : vector<8x128xf32>
    %46 = arith.mulf %19, %45 : vector<8x128xf32>
    %47 = arith.addf %40, %46 : vector<8x128xf32>
    %48 = math.tanh %47 : vector<8x128xf32>
    %cst_32 = arith.constant 1.000000e+00 : f32
    %49 = vector.broadcast %cst_32 : f32 to vector<8x128xf32>
    %50 = arith.subf %49, %35 : vector<8x128xf32>
    %51 = arith.mulf %50, %48 : vector<8x128xf32>
    %52 = arith.mulf %35, %2 : vector<8x128xf32>
    %53 = arith.addf %51, %52 : vector<8x128xf32>
    %c0_33 = arith.constant 0 : index
    %c0_34 = arith.constant 0 : index
    %54 = vector.load %arg21[%c0_33, %c0_34] : memref<8x128xf32, #tpu.memory_space<vmem>>, vector<8x128xf32>
    tpu.vector_store %arg21[%c0_33, %c0_34], %53 {strides = array<i32>} : memref<8x128xf32, #tpu.memory_space<vmem>>, vector<8x128xf32>,
    %55 = arith.truncf %53 : vector<8x128xf32> to vector<8x128xbf16>
    %c0_35 = arith.constant 0 : index
    %c0_36 = arith.constant 0 : index
    %56 = vector.load %arg4[%c0_35, %c0_36] : memref<8x128xf32, #tpu.memory_space<vmem>>, vector<8x128xf32>
    %57 = arith.truncf %56 : vector<8x128xf32> to vector<8x128xbf16>
    %c0_37 = arith.constant 0 : index
    %c0_38 = arith.constant 0 : index
    %58 = vector.load %arg10[%c0_37, %c0_38] : memref<128x384xbf16, #tpu.memory_space<vmem>>, vector<128x128xbf16>
    %cst_39 = arith.constant dense<0.000000e+00> : vector<8x128xf32>
    %59 = tpu.matmul %55, %58, %cst_39 {dimension_numbers = #tpu.dot_dimension_numbers<[1], [0], [0], [1], [0, 0, 1, 1], [], []>} : vector<8x128xbf16>, vector<128x128xbf16>, vector<8x128xf32> -> vector<8x128xf32>
    %c0_40 = arith.constant 0 : index
    %c0_41 = arith.constant 0 : index
    %60 = vector.load %arg11[%c0_40, %c0_41] : memref<1x384xf32, #tpu.memory_space<vmem>>, vector<1x128xf32>
    %61 = vector.broadcast %60 : vector<1x128xf32> to vector<8x128xf32>
    %62 = arith.addf %59, %61 : vector<8x128xf32>
    %c0_42 = arith.constant 0 : index
    %c0_43 = arith.constant 0 : index
    %63 = vector.load %arg12[%c0_42, %c0_43] : memref<128x384xbf16, #tpu.memory_space<vmem>>, vector<128x128xbf16>
    %cst_44 = arith.constant dense<0.000000e+00> : vector<8x128xf32>
    %64 = tpu.matmul %57, %63, %cst_44 {dimension_numbers = #tpu.dot_dimension_numbers<[1], [0], [0], [1], [0, 0, 1, 1], [], []>} : vector<8x128xbf16>, vector<128x128xbf16>, vector<8x128xf32> -> vector<8x128xf32>
    %c0_45 = arith.constant 0 : index
    %c0_46 = arith.constant 0 : index
    %65 = vector.load %arg13[%c0_45, %c0_46] : memref<1x384xf32, #tpu.memory_space<vmem>>, vector<1x128xf32>
    %66 = vector.broadcast %65 : vector<1x128xf32> to vector<8x128xf32>
    %67 = arith.addf %64, %66 : vector<8x128xf32>
    %68 = arith.addf %62, %67 : vector<8x128xf32>
    %69 = arith.negf %68 : vector<8x128xf32>
    %70 = math.exp %69 : vector<8x128xf32>
    %cst_47 = arith.constant 1.000000e+00 : f32
    %71 = vector.broadcast %cst_47 : f32 to vector<8x128xf32>
    %72 = arith.addf %71, %70 : vector<8x128xf32>
    %73 = arith.divf %71, %72 : vector<8x128xf32>
    %c0_48 = arith.constant 0 : index
    %c128_49 = arith.constant 128 : index
    %74 = vector.load %arg10[%c0_48, %c128_49] : memref<128x384xbf16, #tpu.memory_space<vmem>>, vector<128x128xbf16>
    %cst_50 = arith.constant dense<0.000000e+00> : vector<8x128xf32>
    %75 = tpu.matmul %55, %74, %cst_50 {dimension_numbers = #tpu.dot_dimension_numbers<[1], [0], [0], [1], [0, 0, 1, 1], [], []>} : vector<8x128xbf16>, vector<128x128xbf16>, vector<8x128xf32> -> vector<8x128xf32>
    %c0_51 = arith.constant 0 : index
    %c128_52 = arith.constant 128 : index
    %76 = vector.load %arg11[%c0_51, %c128_52] : memref<1x384xf32, #tpu.memory_space<vmem>>, vector<1x128xf32>
    %77 = vector.broadcast %76 : vector<1x128xf32> to vector<8x128xf32>
    %78 = arith.addf %75, %77 : vector<8x128xf32>
    %c0_53 = arith.constant 0 : index
    %c128_54 = arith.constant 128 : index
    %79 = vector.load %arg12[%c0_53, %c128_54] : memref<128x384xbf16, #tpu.memory_space<vmem>>, vector<128x128xbf16>
    %cst_55 = arith.constant dense<0.000000e+00> : vector<8x128xf32>
    %80 = tpu.matmul %57, %79, %cst_55 {dimension_numbers = #tpu.dot_dimension_numbers<[1], [0], [0], [1], [0, 0, 1, 1], [], []>} : vector<8x128xbf16>, vector<128x128xbf16>, vector<8x128xf32> -> vector<8x128xf32>
    %c0_56 = arith.constant 0 : index
    %c128_57 = arith.constant 128 : index
    %81 = vector.load %arg13[%c0_56, %c128_57] : memref<1x384xf32, #tpu.memory_space<vmem>>, vector<1x128xf32>
    %82 = vector.broadcast %81 : vector<1x128xf32> to vector<8x128xf32>
    %83 = arith.addf %80, %82 : vector<8x128xf32>
    %84 = arith.addf %78, %83 : vector<8x128xf32>
    %85 = arith.negf %84 : vector<8x128xf32>
    %86 = math.exp %85 : vector<8x128xf32>
    %cst_58 = arith.constant 1.000000e+00 : f32
    %87 = vector.broadcast %cst_58 : f32 to vector<8x128xf32>
    %88 = arith.addf %87, %86 : vector<8x128xf32>
    %89 = arith.divf %87, %88 : vector<8x128xf32>
    %c0_59 = arith.constant 0 : index
    %c256_60 = arith.constant 256 : index
    %90 = vector.load %arg10[%c0_59, %c256_60] : memref<128x384xbf16, #tpu.memory_space<vmem>>, vector<128x128xbf16>
    %cst_61 = arith.constant dense<0.000000e+00> : vector<8x128xf32>
    %91 = tpu.matmul %55, %90, %cst_61 {dimension_numbers = #tpu.dot_dimension_numbers<[1], [0], [0], [1], [0, 0, 1, 1], [], []>} : vector<8x128xbf16>, vector<128x128xbf16>, vector<8x128xf32> -> vector<8x128xf32>
    %c0_62 = arith.constant 0 : index
    %c256_63 = arith.constant 256 : index
    %92 = vector.load %arg11[%c0_62, %c256_63] : memref<1x384xf32, #tpu.memory_space<vmem>>, vector<1x128xf32>
    %93 = vector.broadcast %92 : vector<1x128xf32> to vector<8x128xf32>
    %94 = arith.addf %91, %93 : vector<8x128xf32>
    %c0_64 = arith.constant 0 : index
    %c256_65 = arith.constant 256 : index
    %95 = vector.load %arg12[%c0_64, %c256_65] : memref<128x384xbf16, #tpu.memory_space<vmem>>, vector<128x128xbf16>
    %cst_66 = arith.constant dense<0.000000e+00> : vector<8x128xf32>
    %96 = tpu.matmul %57, %95, %cst_66 {dimension_numbers = #tpu.dot_dimension_numbers<[1], [0], [0], [1], [0, 0, 1, 1], [], []>} : vector<8x128xbf16>, vector<128x128xbf16>, vector<8x128xf32> -> vector<8x128xf32>
    %c0_67 = arith.constant 0 : index
    %c256_68 = arith.constant 256 : index
    %97 = vector.load %arg13[%c0_67, %c256_68] : memref<1x384xf32, #tpu.memory_space<vmem>>, vector<1x128xf32>
    %98 = vector.broadcast %97 : vector<1x128xf32> to vector<8x128xf32>
    %99 = arith.addf %96, %98 : vector<8x128xf32>
    %100 = arith.mulf %73, %99 : vector<8x128xf32>
    %101 = arith.addf %94, %100 : vector<8x128xf32>
    %102 = math.tanh %101 : vector<8x128xf32>
    %cst_69 = arith.constant 1.000000e+00 : f32
    %103 = vector.broadcast %cst_69 : f32 to vector<8x128xf32>
    %104 = arith.subf %103, %89 : vector<8x128xf32>
    %105 = arith.mulf %104, %102 : vector<8x128xf32>
    %106 = arith.mulf %89, %56 : vector<8x128xf32>
    %107 = arith.addf %105, %106 : vector<8x128xf32>
    %c0_70 = arith.constant 0 : index
    %c0_71 = arith.constant 0 : index
    %108 = vector.load %arg22[%c0_70, %c0_71] : memref<8x128xf32, #tpu.memory_space<vmem>>, vector<8x128xf32>
    tpu.vector_store %arg22[%c0_70, %c0_71], %107 {strides = array<i32>} : memref<8x128xf32, #tpu.memory_space<vmem>>, vector<8x128xf32>,
    %109 = arith.truncf %107 : vector<8x128xf32> to vector<8x128xbf16>
    %c0_72 = arith.constant 0 : index
    %c0_73 = arith.constant 0 : index
    %110 = vector.load %arg5[%c0_72, %c0_73] : memref<8x128xf32, #tpu.memory_space<vmem>>, vector<8x128xf32>
    %111 = arith.truncf %110 : vector<8x128xf32> to vector<8x128xbf16>
    %c0_74 = arith.constant 0 : index
    %c0_75 = arith.constant 0 : index
    %112 = vector.load %arg14[%c0_74, %c0_75] : memref<128x384xbf16, #tpu.memory_space<vmem>>, vector<128x128xbf16>
    %cst_76 = arith.constant dense<0.000000e+00> : vector<8x128xf32>
    %113 = tpu.matmul %109, %112, %cst_76 {dimension_numbers = #tpu.dot_dimension_numbers<[1], [0], [0], [1], [0, 0, 1, 1], [], []>} : vector<8x128xbf16>, vector<128x128xbf16>, vector<8x128xf32> -> vector<8x128xf32>
    %c0_77 = arith.constant 0 : index
    %c0_78 = arith.constant 0 : index
    %114 = vector.load %arg15[%c0_77, %c0_78] : memref<1x384xf32, #tpu.memory_space<vmem>>, vector<1x128xf32>
    %115 = vector.broadcast %114 : vector<1x128xf32> to vector<8x128xf32>
    %116 = arith.addf %113, %115 : vector<8x128xf32>
    %c0_79 = arith.constant 0 : index
    %c0_80 = arith.constant 0 : index
    %117 = vector.load %arg16[%c0_79, %c0_80] : memref<128x384xbf16, #tpu.memory_space<vmem>>, vector<128x128xbf16>
    %cst_81 = arith.constant dense<0.000000e+00> : vector<8x128xf32>
    %118 = tpu.matmul %111, %117, %cst_81 {dimension_numbers = #tpu.dot_dimension_numbers<[1], [0], [0], [1], [0, 0, 1, 1], [], []>} : vector<8x128xbf16>, vector<128x128xbf16>, vector<8x128xf32> -> vector<8x128xf32>
    %c0_82 = arith.constant 0 : index
    %c0_83 = arith.constant 0 : index
    %119 = vector.load %arg17[%c0_82, %c0_83] : memref<1x384xf32, #tpu.memory_space<vmem>>, vector<1x128xf32>
    %120 = vector.broadcast %119 : vector<1x128xf32> to vector<8x128xf32>
    %121 = arith.addf %118, %120 : vector<8x128xf32>
    %122 = arith.addf %116, %121 : vector<8x128xf32>
    %123 = arith.negf %122 : vector<8x128xf32>
    %124 = math.exp %123 : vector<8x128xf32>
    %cst_84 = arith.constant 1.000000e+00 : f32
    %125 = vector.broadcast %cst_84 : f32 to vector<8x128xf32>
    %126 = arith.addf %125, %124 : vector<8x128xf32>
    %127 = arith.divf %125, %126 : vector<8x128xf32>
    %c0_85 = arith.constant 0 : index
    %c128_86 = arith.constant 128 : index
    %128 = vector.load %arg14[%c0_85, %c128_86] : memref<128x384xbf16, #tpu.memory_space<vmem>>, vector<128x128xbf16>
    %cst_87 = arith.constant dense<0.000000e+00> : vector<8x128xf32>
    %129 = tpu.matmul %109, %128, %cst_87 {dimension_numbers = #tpu.dot_dimension_numbers<[1], [0], [0], [1], [0, 0, 1, 1], [], []>} : vector<8x128xbf16>, vector<128x128xbf16>, vector<8x128xf32> -> vector<8x128xf32>
    %c0_88 = arith.constant 0 : index
    %c128_89 = arith.constant 128 : index
    %130 = vector.load %arg15[%c0_88, %c128_89] : memref<1x384xf32, #tpu.memory_space<vmem>>, vector<1x128xf32>
    %131 = vector.broadcast %130 : vector<1x128xf32> to vector<8x128xf32>
    %132 = arith.addf %129, %131 : vector<8x128xf32>
    %c0_90 = arith.constant 0 : index
    %c128_91 = arith.constant 128 : index
    %133 = vector.load %arg16[%c0_90, %c128_91] : memref<128x384xbf16, #tpu.memory_space<vmem>>, vector<128x128xbf16>
    %cst_92 = arith.constant dense<0.000000e+00> : vector<8x128xf32>
    %134 = tpu.matmul %111, %133, %cst_92 {dimension_numbers = #tpu.dot_dimension_numbers<[1], [0], [0], [1], [0, 0, 1, 1], [], []>} : vector<8x128xbf16>, vector<128x128xbf16>, vector<8x128xf32> -> vector<8x128xf32>
    %c0_93 = arith.constant 0 : index
    %c128_94 = arith.constant 128 : index
    %135 = vector.load %arg17[%c0_93, %c128_94] : memref<1x384xf32, #tpu.memory_space<vmem>>, vector<1x128xf32>
    %136 = vector.broadcast %135 : vector<1x128xf32> to vector<8x128xf32>
    %137 = arith.addf %134, %136 : vector<8x128xf32>
    %138 = arith.addf %132, %137 : vector<8x128xf32>
    %139 = arith.negf %138 : vector<8x128xf32>
    %140 = math.exp %139 : vector<8x128xf32>
    %cst_95 = arith.constant 1.000000e+00 : f32
    %141 = vector.broadcast %cst_95 : f32 to vector<8x128xf32>
    %142 = arith.addf %141, %140 : vector<8x128xf32>
    %143 = arith.divf %141, %142 : vector<8x128xf32>
    %c0_96 = arith.constant 0 : index
    %c256_97 = arith.constant 256 : index
    %144 = vector.load %arg14[%c0_96, %c256_97] : memref<128x384xbf16, #tpu.memory_space<vmem>>, vector<128x128xbf16>
    %cst_98 = arith.constant dense<0.000000e+00> : vector<8x128xf32>
    %145 = tpu.matmul %109, %144, %cst_98 {dimension_numbers = #tpu.dot_dimension_numbers<[1], [0], [0], [1], [0, 0, 1, 1], [], []>} : vector<8x128xbf16>, vector<128x128xbf16>, vector<8x128xf32> -> vector<8x128xf32>
    %c0_99 = arith.constant 0 : index
    %c256_100 = arith.constant 256 : index
    %146 = vector.load %arg15[%c0_99, %c256_100] : memref<1x384xf32, #tpu.memory_space<vmem>>, vector<1x128xf32>
    %147 = vector.broadcast %146 : vector<1x128xf32> to vector<8x128xf32>
    %148 = arith.addf %145, %147 : vector<8x128xf32>
    %c0_101 = arith.constant 0 : index
    %c256_102 = arith.constant 256 : index
    %149 = vector.load %arg16[%c0_101, %c256_102] : memref<128x384xbf16, #tpu.memory_space<vmem>>, vector<128x128xbf16>
    %cst_103 = arith.constant dense<0.000000e+00> : vector<8x128xf32>
    %150 = tpu.matmul %111, %149, %cst_103 {dimension_numbers = #tpu.dot_dimension_numbers<[1], [0], [0], [1], [0, 0, 1, 1], [], []>} : vector<8x128xbf16>, vector<128x128xbf16>, vector<8x128xf32> -> vector<8x128xf32>
    %c0_104 = arith.constant 0 : index
    %c256_105 = arith.constant 256 : index
    %151 = vector.load %arg17[%c0_104, %c256_105] : memref<1x384xf32, #tpu.memory_space<vmem>>, vector<1x128xf32>
    %152 = vector.broadcast %151 : vector<1x128xf32> to vector<8x128xf32>
    %153 = arith.addf %150, %152 : vector<8x128xf32>
    %154 = arith.mulf %127, %153 : vector<8x128xf32>
    %155 = arith.addf %148, %154 : vector<8x128xf32>
    %156 = math.tanh %155 : vector<8x128xf32>
    %cst_106 = arith.constant 1.000000e+00 : f32
    %157 = vector.broadcast %cst_106 : f32 to vector<8x128xf32>
    %158 = arith.subf %157, %143 : vector<8x128xf32>
    %159 = arith.mulf %158, %156 : vector<8x128xf32>
    %160 = arith.mulf %143, %110 : vector<8x128xf32>
    %161 = arith.addf %159, %160 : vector<8x128xf32>
    %c0_107 = arith.constant 0 : index
    %c0_108 = arith.constant 0 : index
    %162 = vector.load %arg23[%c0_107, %c0_108] : memref<8x128xf32, #tpu.memory_space<vmem>>, vector<8x128xf32>
    tpu.vector_store %arg23[%c0_107, %c0_108], %161 {strides = array<i32>} : memref<8x128xf32, #tpu.memory_space<vmem>>, vector<8x128xf32>,
    %163 = arith.truncf %161 : vector<8x128xf32> to vector<8x128xbf16>
    %c0_109 = arith.constant 0 : index
    %c0_110 = arith.constant 0 : index
    %164 = vector.load %arg18[%c0_109, %c0_110] : memref<128x256xbf16, #tpu.memory_space<vmem>>, vector<128x256xbf16>
    %cst_111 = arith.constant dense<0.000000e+00> : vector<8x256xf32>
    %165 = tpu.matmul %163, %164, %cst_111 {dimension_numbers = #tpu.dot_dimension_numbers<[1], [0], [0], [1], [0, 0, 1, 1], [], []>} : vector<8x128xbf16>, vector<128x256xbf16>, vector<8x256xf32> -> vector<8x256xf32>
    %c0_112 = arith.constant 0 : index
    %c0_113 = arith.constant 0 : index
    %166 = vector.load %arg19[%c0_112, %c0_113] : memref<1x256xf32, #tpu.memory_space<vmem>>, vector<1x256xf32>
    %167 = vector.broadcast %166 : vector<1x256xf32> to vector<8x256xf32>
    %168 = arith.addf %165, %167 : vector<8x256xf32>
    %169 = vector.extract_strided_slice %168 {offsets = [0, 0], sizes = [8, 128], strides = [1, 1]} : vector<8x256xf32> to vector<8x128xf32>
    %170 = vector.extract_strided_slice %168 {offsets = [0, 128], sizes = [8, 128], strides = [1, 1]} : vector<8x256xf32> to vector<8x128xf32>
    %cst_114 = arith.constant 5.000000e-01 : f32
    %171 = vector.broadcast %cst_114 : f32 to vector<8x128xf32>
    %172 = arith.mulf %170, %171 : vector<8x128xf32>
    %173 = math.exp %172 : vector<8x128xf32>
    %c0_115 = arith.constant 0 : index
    %c0_116 = arith.constant 0 : index
    %174 = vector.load %arg2[%c0_115, %c0_116] : memref<8x128xf32, #tpu.memory_space<vmem>>, vector<8x128xf32>
    %175 = arith.mulf %174, %173 : vector<8x128xf32>
    %176 = arith.addf %175, %169 : vector<8x128xf32>
    %c0_117 = arith.constant 0 : index
    %c0_118 = arith.constant 0 : index
    %177 = vector.load %arg20[%c0_117, %c0_118] : memref<8x128xf32, #tpu.memory_space<vmem>>, vector<8x128xf32>
    tpu.vector_store %arg20[%c0_117, %c0_118], %176 {strides = array<i32>} : memref<8x128xf32, #tpu.memory_space<vmem>>, vector<8x128xf32>,
    return
  }
  func.func @transform_0(%arg0: i32) -> (i32, i32) {
    %c0_i32 = arith.constant 0 : i32
    %c0_i32_0 = arith.constant 0 : i32
    return %arg0, %c0_i32 : i32, i32
  }
  func.func @transform_1(%arg0: i32) -> (i32, i32) {
    %c0_i32 = arith.constant 0 : i32
    %c0_i32_0 = arith.constant 0 : i32
    return %arg0, %c0_i32 : i32, i32
  }
  func.func @transform_2(%arg0: i32) -> (i32, i32) {
    %c0_i32 = arith.constant 0 : i32
    %c0_i32_0 = arith.constant 0 : i32
    return %arg0, %c0_i32 : i32, i32
  }
  func.func @transform_3(%arg0: i32) -> (i32, i32) {
    %c0_i32 = arith.constant 0 : i32
    %c0_i32_0 = arith.constant 0 : i32
    return %arg0, %c0_i32 : i32, i32
  }
  func.func @transform_4(%arg0: i32) -> (i32, i32) {
    %c0_i32 = arith.constant 0 : i32
    %c0_i32_0 = arith.constant 0 : i32
    return %arg0, %c0_i32 : i32, i32
  }
  func.func @transform_5(%arg0: i32) -> (i32, i32) {
    %c0_i32 = arith.constant 0 : i32
    %c0_i32_0 = arith.constant 0 : i32
    %c0_i32_1 = arith.constant 0 : i32
    return %c0_i32, %c0_i32_0 : i32, i32
  }
  func.func @transform_6(%arg0: i32) -> (i32, i32) {
    %c0_i32 = arith.constant 0 : i32
    %c0_i32_0 = arith.constant 0 : i32
    %c0_i32_1 = arith.constant 0 : i32
    return %c0_i32, %c0_i32_0 : i32, i32
  }
  func.func @transform_7(%arg0: i32) -> (i32, i32) {
    %c0_i32 = arith.constant 0 : i32
    %c0_i32_0 = arith.constant 0 : i32
    %c0_i32_1 = arith.constant 0 : i32
    return %c0_i32, %c0_i32_0 : i32, i32
  }
  func.func @transform_8(%arg0: i32) -> (i32, i32) {
    %c0_i32 = arith.constant 0 : i32
    %c0_i32_0 = arith.constant 0 : i32
    %c0_i32_1 = arith.constant 0 : i32
    return %c0_i32, %c0_i32_0 : i32, i32
  }
  func.func @transform_9(%arg0: i32) -> (i32, i32) {
    %c0_i32 = arith.constant 0 : i32
    %c0_i32_0 = arith.constant 0 : i32
    %c0_i32_1 = arith.constant 0 : i32
    return %c0_i32, %c0_i32_0 : i32, i32
  }
  func.func @transform_10(%arg0: i32) -> (i32, i32) {
    %c0_i32 = arith.constant 0 : i32
    %c0_i32_0 = arith.constant 0 : i32
    %c0_i32_1 = arith.constant 0 : i32
    return %c0_i32, %c0_i32_0 : i32, i32
  }
  func.func @transform_11(%arg0: i32) -> (i32, i32) {
    %c0_i32 = arith.constant 0 : i32
    %c0_i32_0 = arith.constant 0 : i32
    %c0_i32_1 = arith.constant 0 : i32
    return %c0_i32, %c0_i32_0 : i32, i32
  }
  func.func @transform_12(%arg0: i32) -> (i32, i32) {
    %c0_i32 = arith.constant 0 : i32
    %c0_i32_0 = arith.constant 0 : i32
    %c0_i32_1 = arith.constant 0 : i32
    return %c0_i32, %c0_i32_0 : i32, i32
  }
  func.func @transform_13(%arg0: i32) -> (i32, i32) {
    %c0_i32 = arith.constant 0 : i32
    %c0_i32_0 = arith.constant 0 : i32
    %c0_i32_1 = arith.constant 0 : i32
    return %c0_i32, %c0_i32_0 : i32, i32
  }
  func.func @transform_14(%arg0: i32) -> (i32, i32) {
    %c0_i32 = arith.constant 0 : i32
    %c0_i32_0 = arith.constant 0 : i32
    %c0_i32_1 = arith.constant 0 : i32
    return %c0_i32, %c0_i32_0 : i32, i32
  }
  func.func @transform_15(%arg0: i32) -> (i32, i32) {
    %c0_i32 = arith.constant 0 : i32
    %c0_i32_0 = arith.constant 0 : i32
    %c0_i32_1 = arith.constant 0 : i32
    return %c0_i32, %c0_i32_0 : i32, i32
  }
  func.func @transform_16(%arg0: i32) -> (i32, i32) {
    %c0_i32 = arith.constant 0 : i32
    %c0_i32_0 = arith.constant 0 : i32
    %c0_i32_1 = arith.constant 0 : i32
    return %c0_i32, %c0_i32_0 : i32, i32
  }
  func.func @transform_17(%arg0: i32) -> (i32, i32) {
    %c0_i32 = arith.constant 0 : i32
    %c0_i32_0 = arith.constant 0 : i32
    %c0_i32_1 = arith.constant 0 : i32
    return %c0_i32, %c0_i32_0 : i32, i32
  }
  func.func @transform_18(%arg0: i32) -> (i32, i32) {
    %c0_i32 = arith.constant 0 : i32
    %c0_i32_0 = arith.constant 0 : i32
    %c0_i32_1 = arith.constant 0 : i32
    return %c0_i32, %c0_i32_0 : i32, i32
  }
  func.func @transform_19(%arg0: i32) -> (i32, i32) {
    %c0_i32 = arith.constant 0 : i32
    %c0_i32_0 = arith.constant 0 : i32
    return %arg0, %c0_i32 : i32, i32
  }
  func.func @transform_20(%arg0: i32) -> (i32, i32) {
    %c0_i32 = arith.constant 0 : i32
    %c0_i32_0 = arith.constant 0 : i32
    return %arg0, %c0_i32 : i32, i32
  }
  func.func @transform_21(%arg0: i32) -> (i32, i32) {
    %c0_i32 = arith.constant 0 : i32
    %c0_i32_0 = arith.constant 0 : i32
    return %arg0, %c0_i32 : i32, i32
  }
  func.func @transform_22(%arg0: i32) -> (i32, i32) {
    %c0_i32 = arith.constant 0 : i32
    %c0_i32_0 = arith.constant 0 : i32
    return %arg0, %c0_i32 : i32, i32
  }
}

</mosaic_0001>

<bundles_post_ra>
// kernel: tpu_custom_call.1
= control target key start
LH: loop header
LB: loop body
LE: loop exit
PB: predicated region body
PF: predicated region fallthrough
CT: control target
= control target key end

     0   :  { %s6091_s0 = inlined_call_operand.vmem [shape: f32[16,128], index: 0, kind: input, shape index: {}]   ;;  %s6092_s1 = inlined_call_operand.vmem [shape: f32[16,128], index: 1, kind: input, shape index: {}]   ;;  %s6093_s2 = inlined_call_operand.hbm [shape: f32[16,128], index: 2, kind: input, shape index: {}, may-alias: {2,20}]   ;;  %s6094_s3 = inlined_call_operand.hbm [shape: f32[16,128], index: 3, kind: input, shape index: {}, may-alias: {3,21}]   ;;  %s6095_s4 = inlined_call_operand.hbm [shape: f32[16,128], index: 4, kind: input, shape index: {}, may-alias: {4,22}]   ;;  %s6096_s5 = inlined_call_operand.hbm [shape: bf16[128,384], index: 5, kind: input, shape index: {}]   ;;  %s6097_s6 = inlined_call_operand.vmem [shape: f32[1,384], index: 6, kind: input, shape index: {}]   ;;  %s6098_s7 = inlined_call_operand.hbm [shape: bf16[128,384], index: 7, kind: input, shape index: {}]   ;;  %s6099_s8 = inlined_call_operand.vmem [shape: f32[1,384], index: 8, kind: input, shape index: {}]   ;;  %s6100_s9 = inlined_call_operand.hbm [shape: bf16[128,384], index: 9, kind: input, shape index: {}]   ;;  %s6101_s10 = inlined_call_operand.vmem [shape: f32[1,384], index: 10, kind: input, shape index: {}]   ;;  %s6102_s11 = inlined_call_operand.hbm [shape: bf16[128,384], index: 11, kind: input, shape index: {}]   ;;  %s6103_s12 = inlined_call_operand.vmem [shape: f32[1,384], index: 12, kind: input, shape index: {}]   ;;  %s6104_s13 = inlined_call_operand.hbm [shape: bf16[128,384], index: 13, kind: input, shape index: {}]   ;;  %s6105_s14 = inlined_call_operand.vmem [shape: f32[1,384], index: 14, kind: input, shape index: {}]   ;;  %s6106_s15 = inlined_call_operand.hbm [shape: bf16[128,384], index: 15, kind: input, shape index: {}]   ;;  %s6107_s16 = inlined_call_operand.vmem [shape: f32[1,384], index: 16, kind: input, shape index: {}]   ;;  %s6108_s17 = inlined_call_operand.hbm [shape: bf16[128,256], index: 17, kind: input, shape index: {}]   ;;  %s6109_s18 = inlined_call_operand.vmem [shape: f32[1,256], index: 18, kind: input, shape index: {}]   ;;  %s6110_s19 = inlined_call_operand.hbm [shape: f32[16,128], index: 19, kind: output, shape index: {0}]   ;;  %s6111_s20 = inlined_call_operand.hbm [shape: f32[16,128], index: 20, kind: output, shape index: {1}, may-alias: {2,20}]   ;;  %s6112_s21 = inlined_call_operand.hbm [shape: f32[16,128], index: 21, kind: output, shape index: {2}, may-alias: {3,21}]   ;;  %s6113_s22 = inlined_call_operand.hbm [shape: f32[16,128], index: 22, kind: output, shape index: {3}, may-alias: {4,22}]  }
   0x1   :  { %6160 = sst [smem:[#allocation40_spill]] %s6091_s0 }
   0x2   :  { %6161 = sst [smem:[#allocation41_spill]] %s6092_s1 }
   0x3   :  { %6162 = sst [smem:[#allocation42_spill]] %s6093_s2 }
   0x4   :  { %6163 = sst [smem:[#allocation43_spill]] %s6094_s3 }
   0x5   :  { %6164 = sst [smem:[#allocation44_spill]] %s6095_s4 }
   0x6   :  { %6165 = sst [smem:[#allocation45_spill]] %s6096_s5 }
   0x7   :  { %6166 = sst [smem:[#allocation46_spill]] %s6097_s6 }
   0x8   :  { %6167 = sst [smem:[#allocation47_spill]] %s6098_s7 }
   0x9   :  { %6168 = sst [smem:[#allocation48_spill]] %s6099_s8 }
   0xa   :  { %6169 = sst [smem:[#allocation49_spill]] %s6100_s9 }
   0xb   :  { %6170 = sst [smem:[#allocation50_spill]] %s6101_s10 }
   0xc   :  { %6171 = sst [smem:[#allocation51_spill]] %s6103_s12 }
   0xd   :  { %6172 = sst [smem:[#allocation52_spill]] %s6104_s13 }
   0xe   :  { %6173 = sst [smem:[#allocation53_spill]] %s6105_s14 }
   0xf   :  { %6174 = sst [smem:[#allocation54_spill]] %s6107_s16 }
  0x10   :  { %6175 = sst [smem:[#allocation55_spill]] %s6109_s18 }
  0x11   :  { %6176 = sst [smem:[#allocation56_spill]] %s6110_s19 }
  0x12   :  { %6177 = sst [smem:[#allocation57_spill]] %s6111_s20 }
  0x13   :  { %6178 = sst [smem:[#allocation58_spill]] %s6112_s21 }
  0x14   :  { %6179 = sst [smem:[#allocation59_spill]] %s6113_s22 }
  0x15   :  { %28 = vsyncpa [#allocation3], 0 }
  0x16   :  { %30 = vsyncpa [#allocation3 + $0x1], 0 }
  0x17   :  { %31 = vsyncpa [#allocation6], 0 }
  0x18   :  { %33 = vsyncpa [#allocation6 + $0x1], 0 }
  0x19   :  { %34 = vsyncpa [#allocation9], 0 }
  0x1a   :  { %35 = vsyncpa [#allocation12], 0 }
  0x1b   :  { %36 = vsyncpa [#allocation15], 0 }
  0x1c   :  { %37 = vsyncpa [#allocation18], 0 }
  0x1d   :  { %38 = vsyncpa [#allocation4], 0 }
  0x1e   :  { %40 = vsyncpa [#allocation4 + $0x1], 0 }
  0x1f   :  { %41 = vsyncpa [#allocation21], 0 }
  0x20   :  { %43 = vsyncpa [#allocation21 + $0x1], 0 }
  0x21   :  { %44 = vsyncpa [#allocation24], 0 }
  0x22   :  { %46 = vsyncpa [#allocation24 + $0x1], 0  ;;  %s5267_s3 = smov 0   ;;  %s5269_s28 = smov 0  }
  0x23   :  { %s5271_s29 = smov 0   ;;  %s5273_s30 = smov 0  }
  0x24 LB: > { %6180 = sst [smem:[#allocation34_spill]] %s5117_s3  ;;  %s5131_s4 = smov [#allocation8]   ;;  %s5129_s30 = sphi %s5273_s30, %s6243_s30   ;;  %s5125_s29 = sphi %s5271_s29, %s6247_s29   ;;  %s5121_s28 = sphi %s5269_s28, %s6246_s28   ;;  %s5117_s3 = sphi %s5267_s3, %s6245_s3  }
  0x25   : > { %6181 = sst [smem:[#allocation35_spill]] %s5129_s30  ;;  %s597_s0 = sshll.u32 %s5131_s4, 4  ;;  %s5293_s0 = int_to_ptr.vmem [resolvable:$true] %s597_s0 }
  0x26   : > { %s5288_s23 = sadd.s32 4294967295, %s5129_s30   ;;  %p3532_p0 = scmp.ge.s32.totalorder %s5129_s30, 1 }
  0x27   : > { %p6138_p1 = scmp.eq.s32.totalorder %s5288_s23, 0  ;;  %p585_p2 = scmp.lt.s32.totalorder %s5129_s30, 3 }
  0x28   : > { %s5132_s5 = smov [#allocation11]   ;;  %s5133_s25 = smov [#allocation14]  }
  0x29   : > { %p5295_p3 = pnand %p3532_p0, %p585_p2  ;;  %s629_s24 = sshll.u32 %s5132_s5, 4  ;;  %s5308_s24 = int_to_ptr.vmem [resolvable:$true] %s629_s24 }
  0x2a   : > { %s661_s26 = sshll.u32 %s5133_s25, 4  ;;  %s6184_s4 = sld [smem:[#allocation45_spill]]  ;;  %s5310_s26 = int_to_ptr.vmem [resolvable:$true] %s661_s26 }
  0x2b   : > { %s6182_s1 = scalar_select %p5295_p3, 1, 0 }
  0x2c   : > { %p4358_p5 = pneg %p5295_p3 }
  0x2e   : > { %p5304_p6 = pnand %p4358_p5, %p6138_p1 }
  0x30   : > { %s6183_s6 = scalar_select %p5304_p6, 1, 0 }
  0x31   : > { %s4665_s19 = scalar_lea.hbm %s6184_s4, 3072  ;;  %p5320_p8 = pneg %p5304_p6 }
  0x32   : > { %p4666_p7 = scmp.ne.s32.totalorder %s6184_s4, %s4665_s19  ;;  %p4672_p11 = scmp.lt.u32.totalorder %s4665_s19, %s6184_s4 }
  0x33   : > { %s6185_s5 = scalar_select %p5320_p8, 1, 0 }
  0x34   : > { %p4668_p9 = pnand %p5320_p8, %p4666_p7 }
  0x36   : > { %p4669_p10 = pneg %p4668_p9 }
  0x38   : > { %p4674_p12 = pnand %p4672_p11, %p4669_p10 }
  0x3a   : > { %4677 = shalt.err (!%p4674_p12)
}
  0x3b   : > { %s4678_s18 = scalar_lea.vmem %s5293_s0, 3072  ;;  %p4686_p5 = scmp.lt.s32.totalorder %s5293_s0, %s5293_s0 }
  0x3c   : > { %p4679_p13 = scmp.ne.s32.totalorder %s5293_s0, %s4678_s18  ;;  %p4687_p4 = scmp.lt.s32.totalorder %s4678_s18, %s4678_s18 }
  0x3e   : > { %p4681_p0 = pnand %p4679_p13, %p5320_p8  ;;  %p4688_p7 = por %p4687_p4, %p4686_p5 }
  0x40   : > { %p4682_p2 = pneg %p4681_p0 }
  0x42   : > { %p4689_p9 = pnand %p4688_p7, %p4682_p2 }
  0x44   : > { %4692 = shalt.err (!%p4689_p9)
}
  0x45   : > { %s6128_s22 = smov 192   ;;  %s6130_s19 = smov 12  }
  0x46   : > { %4361 = dma.hbm_to_vmem [thread:$0]  (!%p5304_p6), %s6184_s4, 3072, %s5293_s0, [#allocation9], %s6128_s22, %s6128_s22, %s6130_s19  }
  0x47   : > { %s6186_s9 = sld [smem:[#allocation49_spill]] }
  0x4d   : > { %s4693_s18 = scalar_lea.hbm %s6186_s9, 3072 }
  0x4e   : > { %p4694_p4 = scmp.ne.s32.totalorder %s6186_s9, %s4693_s18  ;;  %p4700_p12 = scmp.lt.u32.totalorder %s4693_s18, %s6186_s9 }
  0x50   : > { %p4696_p10 = pnand %p4694_p4, %p5320_p8 }
  0x52   : > { %p4697_p11 = pneg %p4696_p10 }
  0x54   : > { %p4702_p13 = pnand %p4700_p12, %p4697_p11 }
  0x56   : > { %4705 = shalt.err (!%p4702_p13)
}
  0x57   : > { %s4706_s0 = scalar_lea.vmem %s5308_s24, 3072  ;;  %p4714_p7 = scmp.lt.s32.totalorder %s5308_s24, %s5308_s24 }
  0x58   : > { %p4707_p0 = scmp.ne.s32.totalorder %s5308_s24, %s4706_s0  ;;  %p4715_p9 = scmp.lt.s32.totalorder %s4706_s0, %s4706_s0 }
  0x5a   : > { %p4709_p2 = pnand %p4707_p0, %p5320_p8  ;;  %p4716_p4 = por %p4715_p9, %p4714_p7 }
  0x5c   : > { %p4710_p5 = pneg %p4709_p2 }
  0x5e   : > { %p4717_p10 = pnand %p4716_p4, %p4710_p5 }
  0x60   : > { %4720 = shalt.err (!%p4717_p10)
}
  0x61   : > { %4367 = dma.hbm_to_vmem [thread:$0]  (!%p5304_p6), %s6186_s9, 3072, %s5308_s24, [#allocation12], %s6128_s22, %s6128_s22, %s6130_s19  }
  0x62   : > { %s6187_s13 = sld [smem:[#allocation52_spill]] }
  0x68   : > { %s4721_s21 = scalar_lea.hbm %s6187_s13, 3072 }
  0x69   : > { %p4722_p11 = scmp.ne.s32.totalorder %s6187_s13, %s4721_s21  ;;  %p4728_p0 = scmp.lt.u32.totalorder %s4721_s21, %s6187_s13 }
  0x6b   : > { %p4724_p12 = pnand %p4722_p11, %p5320_p8 }
  0x6d   : > { %p4725_p13 = pneg %p4724_p12 }
  0x6f   : > { %p4730_p2 = pnand %p4728_p0, %p4725_p13 }
  0x71   : > { %4733 = shalt.err (!%p4730_p2)
}
  0x72   : > { %s4734_s24 = scalar_lea.vmem %s5310_s26, 3072  ;;  %p4742_p4 = scmp.lt.s32.totalorder %s5310_s26, %s5310_s26 }
  0x73   : > { %p4735_p5 = scmp.ne.s32.totalorder %s5310_s26, %s4734_s24  ;;  %p4743_p10 = scmp.lt.s32.totalorder %s4734_s24, %s4734_s24 }
  0x75   : > { %p4737_p7 = pnand %p4735_p5, %p5320_p8  ;;  %p4744_p11 = por %p4743_p10, %p4742_p4 }
  0x77   : > { %p4738_p9 = pneg %p4737_p7 }
  0x79   : > { %p4745_p12 = pnand %p4744_p11, %p4738_p9 }
  0x7b   : > { %4748 = shalt.err (!%p4745_p12)
}
  0x7c   : > { %4373 = dma.hbm_to_vmem [thread:$0]  (!%p5304_p6), %s6187_s13, 3072, %s5310_s26, [#allocation15], %s6128_s22, %s6128_s22, %s6130_s19  }
  0x7d   : > { %s6127_s14 = sadd.s32 4294967294, %s5129_s30   ;;  %s5398_s16 = sadd.s32 1, %s5129_s30  }
  0x7e   : > { %6188 = sst [smem:[#allocation36_spill]] %s5398_s16  ;;  %s111_s20 = sadd.s32 1, %s5125_s29 }
  0x7f   : > { %s108_s21 = ssub.s32 %s5129_s30, %s5398_s16  ;;  %p118_p13 = scmp.ne.s32.totalorder %s5125_s29, %s5121_s28 }
  0x80   : > { %p109_p0 = scmp.eq.s32.totalorder %s108_s21, 0  ;;  %p119_p2 = scmp.eq.s32.totalorder %s5129_s30, 0 }
  0x81   : > { %p124_p5 = scmp.ne.s32.totalorder %s5121_s28, %s5117_s3  ;;  %p494_p7 = scmp.eq.s32.totalorder %s5288_s23, 1 }
  0x82   : > { %s5410_s2 = scalar_select %p109_p0, %s5125_s29, %s111_s20  }
  0x83   : > { %p120_p9 = por %p119_p2, %p118_p13  ;;  %p5414_p4 = por %p6138_p1, %p124_p5 }
  0x84   : > { %6189 = sst [smem:[#allocation37_spill]] %s5410_s2  ;;  %p5418_p10 = por %p494_p7, %p118_p13 }
  0x85   : > { %s6190_s26 = scalar_select %p5414_p4, 1, 0 }
  0x86   : > { %s6191_s27 = scalar_select %p5418_p10, 1, 0 }
  0x87   : > { %p500_p11 = scmp.eq.s32.totalorder %s6127_s14, 1  ;;  %p4410_p12 = scmp.lt.s32.totalorder %s5129_s30, 2 }
  0x88   : > { %6192 = sst [smem:[#allocation38_spill]] %s6191_s27  ;;  %s6132_s25 = sand.u32 1, %s5125_s29  }
  0x89   : > { %p5426_p3 = por %p500_p11, %p124_p5  ;;  %s5432_s24 = sshll.u32 %s6132_s25, 3 }
  0x8a   : > { %s5435_s0 = sshll.u32 %s5129_s30, 7  ;;  %p5437_p0 = pnand %p4410_p12, %p120_p9 }
  0x8b   : > { %s6193_s18 = scalar_select %p5426_p3, 1, 0 }
  0x8c   : > { %s6195_s12 = scalar_select %p5437_p0, 1, 0 }
  0x8d   : > { %6194 = sst [smem:[#allocation39_spill]] %s6193_s18  ;;  %s742_s20 = sand.u32 1, %s5129_s30  }
  0x8e   : > { %s6196_s22 = sld [smem:[#allocation43_spill]]  ;;  %s746_s25 = scalar_lea.vmem [#allocation5], %s5432_s24 }
  0x8f   : > { %s753_s4 = sshll.u32 %s746_s25, 4  ;;  %s5451_s9 = scalar_lea.sflag [#allocation6], %s742_s20  ;;  %s5449_s4 = int_to_ptr.vmem [resolvable:$true] %s753_s4 }
  0x90   : > { %p5457_p2 = pneg %p5437_p0 }
  0x92   : > { %s6197_s2 = scalar_select %p5457_p2, 1, 0 }
  0x94   : > { %s5446_s19 = scalar_lea.hbm %s6196_s22, %s5435_s0  ;;  %s4754_s16 = scalar_lea.hbm %s6196_s22, 256 }
  0x95   : > { %s4749_s13 = scalar_lea.hbm %s5446_s19, 128  ;;  %p4755_p9 = scmp.lt.u32.totalorder %s5446_s19, %s6196_s22 }
  0x96   : > { %p4750_p13 = scmp.ne.s32.totalorder %s5446_s19, %s4749_s13  ;;  %p4756_p11 = scmp.lt.u32.totalorder %s4754_s16, %s4749_s13 }
  0x97   : > { %p4758_p1 = scmp.lt.u32.totalorder %s4749_s13, %s5446_s19 }
  0x98   : > { %p4752_p5 = pnand %p5457_p2, %p4750_p13  ;;  %p4757_p12 = por %p4756_p11, %p4755_p9 }
  0x9a   : > { %p4753_p7 = pneg %p4752_p5  ;;  %p4759_p3 = por %p4758_p1, %p4757_p12 }
  0x9c   : > { %p4760_p10 = pnand %p4759_p3, %p4753_p7 }
  0x9e   : > { %4763 = shalt.err (!%p4760_p10)
}
  0x9f   : > { %s4764_s20 = scalar_lea.vmem %s5449_s4, 128  ;;  %s5136_s14 = smov [#allocation5]  }
  0xa0   : > { %p4765_p13 = scmp.ne.s32.totalorder %s5449_s4, %s4764_s20  ;;  %s4769_s21 = sshll.u32 %s5136_s14, 4  ;;  %s4770_s21 = int_to_ptr.vmem [resolvable:$false] %s4769_s21 }
  0xa1   : > { %s4771_s30 = scalar_lea.vmem %s4770_s21, 256  ;;  %p4772_p6 = scmp.lt.s32.totalorder %s5449_s4, %s4770_s21 }
  0xa2   : > { %p4767_p5 = pnand %p4765_p13, %p5457_p2  ;;  %p4773_p8 = scmp.lt.s32.totalorder %s4771_s30, %s4764_s20 }
  0xa4   : > { %p4768_p4 = pneg %p4767_p5  ;;  %p4774_p9 = por %p4773_p8, %p4772_p6 }
  0xa6   : > { %p4775_p11 = pnand %p4774_p9, %p4768_p4 }
  0xa8   : > { %4778 = shalt.err (!%p4775_p11)
}
  0xa9   : > { %4386 = dma.hbm_to_vmem [thread:$0]  (!%p5437_p0), %s5446_s19, 128, %s5449_s4, %s5451_s9  }
  0xaa   : > { %s5137_s13 = smov [#allocation10]   ;;  %s5138_s25 = smov [#allocation13]  }
  0xab   : > { %s613_s16 = sshll.u32 %s5137_s13, 4  ;;  %s645_s22 = sshll.u32 %s5138_s25, 4  ;;  %s614_s16 = int_to_ptr.vmem [resolvable:$true] %s613_s16  ;;  %s646_s22 = int_to_ptr.vmem [resolvable:$true] %s645_s22 }
  0xac   : > { %s6198_s7 = sld [smem:[#allocation47_spill]]  ;;  %p6199_p3 = scmp.ne.s32.totalorder %s6185_s5, 0 }
  0xb2   : > { %s4779_s21 = scalar_lea.hbm %s6198_s7, 3072 }
  0xb3   : > { %p4780_p1 = scmp.ne.s32.totalorder %s6198_s7, %s4779_s21  ;;  %p4786_p4 = scmp.lt.u32.totalorder %s4779_s21, %s6198_s7 }
  0xb5   : > { %p4782_p6 = pnand %p4780_p1, %p6199_p3 }
  0xb7   : > { %p4783_p8 = pneg %p4782_p6 }
  0xb9   : > { %p4788_p10 = pnand %p4786_p4, %p4783_p8 }
  0xbb   : > { %4791 = shalt.err (!%p4788_p10)
}
  0xbc   : > { %s4792_s4 = scalar_lea.vmem %s614_s16, 3072  ;;  %p4800_p5 = scmp.lt.s32.totalorder %s614_s16, %s614_s16 }
  0xbd   : > { %p4793_p7 = scmp.ne.s32.totalorder %s614_s16, %s4792_s4  ;;  %p4801_p9 = scmp.lt.s32.totalorder %s4792_s4, %s4792_s4 }
  0xbf   : > { %p4795_p12 = pnand %p4793_p7, %p6199_p3  ;;  %p4802_p11 = por %p4801_p9, %p4800_p5 }
  0xc1   : > { %p4796_p13 = pneg %p4795_p12 }
  0xc3   : > { %p4803_p0 = pnand %p4802_p11, %p4796_p13 }
  0xc5   : > { %4806 = shalt.err (!%p4803_p0)
}
  0xc6   : > { %p6200_p1 = scmp.ne.s32.totalorder %s6183_s6, 0  ;;  %s6201_s19 = smov 12  }
  0xc7   : > { %s6202_s18 = smov 192   ;;  %s4807_s14 = scalar_lea.hbm %s6102_s11, 3072 }
  0xc8   : > { %4364 = dma.hbm_to_vmem [thread:$0]  (!%p6200_p1), %s6198_s7, 3072, %s614_s16, [#allocation9], %s6202_s18, %s6202_s18, %s6201_s19  }
  0xc9   : > { %p4808_p6 = scmp.ne.s32.totalorder %s6102_s11, %s4807_s14  ;;  %p4814_p4 = scmp.lt.u32.totalorder %s4807_s14, %s6102_s11 }
  0xcb   : > { %p4810_p0 = pnand %p4808_p6, %p6199_p3 }
  0xcd   : > { %p4811_p8 = pneg %p4810_p0 }
  0xcf   : > { %p4816_p10 = pnand %p4814_p4, %p4811_p8 }
  0xd1   : > { %4819 = shalt.err (!%p4816_p10)
}
  0xd2   : > { %s4820_s3 = scalar_lea.vmem %s646_s22, 3072  ;;  %p4828_p5 = scmp.lt.s32.totalorder %s646_s22, %s646_s22 }
  0xd3   : > { %p4821_p7 = scmp.ne.s32.totalorder %s646_s22, %s4820_s3  ;;  %p4829_p9 = scmp.lt.s32.totalorder %s4820_s3, %s4820_s3 }
  0xd5   : > { %p4823_p12 = pnand %p4821_p7, %p6199_p3  ;;  %p4830_p11 = por %p4829_p9, %p4828_p5 }
  0xd7   : > { %p4824_p13 = pneg %p4823_p12 }
  0xd9   : > { %p4831_p2 = pnand %p4830_p11, %p4824_p13 }
  0xdb   : > { %4834 = shalt.err (!%p4831_p2)
}
  0xdc   : > { %4370 = dma.hbm_to_vmem [thread:$0]  (!%p6200_p1), %s6102_s11, 3072, %s646_s22, [#allocation12], %s6202_s18, %s6202_s18, %s6201_s19  }
  0xdd   : > { %s5139_s13 = smov [#allocation16]   ;;  %s5140_s14 = smov [#allocation17]  }
  0xde   : > { %s677_s25 = sshll.u32 %s5139_s13, 4  ;;  %s693_s21 = sshll.u32 %s5140_s14, 4  ;;  %s678_s25 = int_to_ptr.vmem [resolvable:$true] %s677_s25  ;;  %s694_s21 = int_to_ptr.vmem [resolvable:$true] %s693_s21 }
  0xdf   : > { %s4835_s4 = scalar_lea.hbm %s6106_s15, 3072 }
  0xe0   : > { %p4836_p2 = scmp.ne.s32.totalorder %s6106_s15, %s4835_s4  ;;  %p4842_p8 = scmp.lt.u32.totalorder %s4835_s4, %s6106_s15 }
  0xe2   : > { %p4838_p6 = pnand %p4836_p2, %p6199_p3 }
  0xe4   : > { %p4839_p0 = pneg %p4838_p6 }
  0xe6   : > { %p4844_p4 = pnand %p4842_p8, %p4839_p0 }
  0xe8   : > { %4847 = shalt.err (!%p4844_p4)
}
  0xe9   : > { %s4848_s22 = scalar_lea.vmem %s678_s25, 3072  ;;  %p4856_p13 = scmp.lt.s32.totalorder %s678_s25, %s678_s25 }
  0xea   : > { %p4849_p10 = scmp.ne.s32.totalorder %s678_s25, %s4848_s22  ;;  %p4857_p5 = scmp.lt.s32.totalorder %s4848_s22, %s4848_s22 }
  0xec   : > { %p4851_p7 = pnand %p4849_p10, %p6199_p3  ;;  %p4858_p9 = por %p4857_p5, %p4856_p13 }
  0xee   : > { %p4852_p12 = pneg %p4851_p7 }
  0xf0   : > { %p4859_p11 = pnand %p4858_p9, %p4852_p12 }
  0xf2   : > { %4862 = shalt.err (!%p4859_p11)
}
  0xf3   : > { %4376 = dma.hbm_to_vmem [thread:$0]  (!%p6200_p1), %s6106_s15, 3072, %s678_s25, [#allocation15], %s6202_s18, %s6202_s18, %s6201_s19  }
  0xf4   : > { %s4863_s14 = scalar_lea.hbm %s6108_s17, 2048 }
  0xf5   : > { %p4864_p2 = scmp.ne.s32.totalorder %s6108_s17, %s4863_s14  ;;  %p4870_p8 = scmp.lt.u32.totalorder %s4863_s14, %s6108_s17 }
  0xf7   : > { %p4866_p6 = pnand %p4864_p2, %p6199_p3 }
  0xf9   : > { %p4867_p0 = pneg %p4866_p6 }
  0xfb   : > { %p4872_p4 = pnand %p4870_p8, %p4867_p0 }
  0xfd   : > { %4875 = shalt.err (!%p4872_p4)
}
  0xfe   : > { %s4876_s16 = scalar_lea.vmem %s694_s21, 2048  ;;  %p4884_p13 = scmp.lt.s32.totalorder %s694_s21, %s694_s21 }
  0xff   : > { %p4877_p10 = scmp.ne.s32.totalorder %s694_s21, %s4876_s16  ;;  %p4885_p5 = scmp.lt.s32.totalorder %s4876_s16, %s4876_s16 }
 0x101   : > { %p4879_p7 = pnand %p4877_p10, %p6199_p3  ;;  %p4886_p9 = por %p4885_p5, %p4884_p13 }
 0x103   : > { %p4880_p12 = pneg %p4879_p7 }
 0x105   : > { %p4887_p11 = pnand %p4886_p9, %p4880_p12 }
 0x107   : > { %4890 = shalt.err (!%p4887_p11)
}
 0x108   : > { %s5141_s19 = smov 128   ;;  %s5142_s18 = smov 8  }
 0x109   : > { %4379 = dma.hbm_to_vmem [thread:$0]  (!%p6200_p1), %s6108_s17, 2048, %s694_s21, [#allocation18], %s5141_s19, %s5141_s19, %s5142_s18  }
 0x10a   : > { %s6203_s10 = sld [smem:[#allocation42_spill]]  ;;  %s728_s13 = scalar_lea.vmem [#allocation2], %s5432_s24 }
 0x10b   : > { %s735_s14 = sshll.u32 %s728_s13, 4  ;;  %s6204_s6 = sld [smem:[#allocation44_spill]]  ;;  %s5569_s14 = int_to_ptr.vmem [resolvable:$true] %s735_s14 }
 0x10c   : > { %s6205_s3 = sand.u32 1, %s5125_s29   ;;  %p6206_p1 = scmp.ne.s32.totalorder %s6197_s2, 0 }
 0x10d   : > { %s725_s21 = scalar_lea.sflag [#allocation3], %s6205_s3 }
 0x110   : > { %s5566_s27 = scalar_lea.hbm %s6203_s10, %s5435_s0  ;;  %s4896_s25 = scalar_lea.hbm %s6203_s10, 256 }
 0x111   : > { %s5575_s4 = scalar_lea.hbm %s6204_s6, %s5435_s0  ;;  %s4891_s16 = scalar_lea.hbm %s5566_s27, 128 }
 0x112   : > { %p4892_p3 = scmp.ne.s32.totalorder %s5566_s27, %s4891_s16  ;;  %p4897_p0 = scmp.lt.u32.totalorder %s5566_s27, %s6203_s10 }
 0x113   : > { %p4898_p8 = scmp.lt.u32.totalorder %s4896_s25, %s4891_s16  ;;  %p4900_p10 = scmp.lt.u32.totalorder %s4891_s16, %s5566_s27 }
 0x114   : > { %p4894_p2 = pnand %p4892_p3, %p6206_p1 }
 0x115   : > { %p4899_p4 = por %p4898_p8, %p4897_p0 }
 0x116   : > { %p4895_p6 = pneg %p4894_p2 }
 0x117   : > { %p4901_p7 = por %p4900_p10, %p4899_p4 }
 0x119   : > { %p4902_p12 = pnand %p4901_p7, %p4895_p6 }
 0x11b   : > { %4905 = shalt.err (!%p4902_p12)
}
 0x11c   : > { %s4906_s0 = scalar_lea.vmem %s5569_s14, 128  ;;  %s5143_s7 = smov [#allocation2]  }
 0x11d   : > { %p4907_p13 = scmp.ne.s32.totalorder %s5569_s14, %s4906_s0  ;;  %s4911_s13 = sshll.u32 %s5143_s7, 4  ;;  %s4912_s13 = int_to_ptr.vmem [resolvable:$false] %s4911_s13 }
 0x11e   : > { %s4913_s20 = scalar_lea.vmem %s4912_s13, 256  ;;  %p4914_p11 = scmp.lt.s32.totalorder %s5569_s14, %s4912_s13 }
 0x11f   : > { %p4909_p5 = pnand %p4907_p13, %p6206_p1  ;;  %p4915_p3 = scmp.lt.s32.totalorder %s4913_s20, %s4906_s0 }
 0x121   : > { %p4910_p9 = pneg %p4909_p5  ;;  %p4916_p2 = por %p4915_p3, %p4914_p11 }
 0x123   : > { %p4917_p0 = pnand %p4916_p2, %p4910_p9 }
 0x125   : > { %4920 = shalt.err (!%p4917_p0)
}
 0x126   : > { %p6207_p6 = scmp.ne.s32.totalorder %s6195_s12, 0  ;;  %s764_s30 = scalar_lea.vmem [#allocation7], %s5432_s24 }
 0x127   : > { %s771_s3 = sshll.u32 %s764_s30, 4  ;;  %s4921_s16 = scalar_lea.hbm %s5575_s4, 128  ;;  %s772_s3 = int_to_ptr.vmem [resolvable:$true] %s771_s3 }
 0x128   : > { %4383 = dma.hbm_to_vmem [thread:$0]  (!%p6207_p6), %s5566_s27, 128, %s5569_s14, %s725_s21  }
 0x129   : > { %p4922_p8 = scmp.ne.s32.totalorder %s5575_s4, %s4921_s16  ;;  %s4926_s25 = scalar_lea.hbm %s6204_s6, 256 }
 0x12a   : > { %p4927_p7 = scmp.lt.u32.totalorder %s5575_s4, %s6204_s6  ;;  %p4928_p12 = scmp.lt.u32.totalorder %s4926_s25, %s4921_s16 }
 0x12b   : > { %p4924_p4 = pnand %p4922_p8, %p6206_p1  ;;  %p4930_p5 = scmp.lt.u32.totalorder %s4921_s16, %s5575_s4 }
 0x12c   : > { %p4929_p13 = por %p4928_p12, %p4927_p7 }
 0x12d   : > { %p4925_p10 = pneg %p4924_p4 }
 0x12e   : > { %p4931_p9 = por %p4930_p5, %p4929_p13 }
 0x130   : > { %p4932_p11 = pnand %p4931_p9, %p4925_p10 }
 0x132   : > { %4935 = shalt.err (!%p4932_p11)
}
 0x133   : > { %s4936_s24 = scalar_lea.vmem %s772_s3, 128  ;;  %s5144_s27 = smov [#allocation7]  }
 0x134   : > { %p4937_p3 = scmp.ne.s32.totalorder %s772_s3, %s4936_s24  ;;  %s4941_s14 = sshll.u32 %s5144_s27, 4  ;;  %s4942_s14 = int_to_ptr.vmem [resolvable:$false] %s4941_s14 }
 0x135   : > { %s4943_s21 = scalar_lea.vmem %s4942_s14, 256  ;;  %p4944_p8 = scmp.lt.s32.totalorder %s772_s3, %s4942_s14 }
 0x136   : > { %p4939_p2 = pnand %p4937_p3, %p6206_p1  ;;  %p4945_p4 = scmp.lt.s32.totalorder %s4943_s21, %s4936_s24 }
 0x138   : > { %p4940_p0 = pneg %p4939_p2  ;;  %p4946_p6 = por %p4945_p4, %p4944_p8 }
 0x13a   : > { %p4947_p7 = pnand %p4946_p6, %p4940_p0 }
 0x13c   : > { %4950 = shalt.err (!%p4947_p7)
}
 0x13d   : > { %p6208_p12 = scmp.ne.s32.totalorder %s6195_s12, 0  ;;  %p6209_p10 = scmp.ne.s32.totalorder %s6182_s1, 0 }
 0x13e   : > { %s5622_s2 = sand.u32 (!%p6209_p10), 1, %s5121_s28   ;;  %p6210_p1 = scmp.ne.s32.totalorder (!%p6209_p10), %s6190_s26, 0 }
 0x13f   : > { %4389 = dma.hbm_to_vmem [thread:$0]  (!%p6208_p12), %s5575_s4, 128, %s772_s3, %s5451_s9  }
 0x140   : > { %780 = sbr.rel (%p6209_p10) target bundleno = 1523 (0x5f3), region = 96  ;;  %s5625_s0 = sshll.u32 (!%p6209_p10), %s5622_s2, 3 }
 0x141   : > { %s783_s7 = scalar_lea.sflag (!%p6209_p10), [#allocation3], %s5622_s2  ;;  %s786_s13 = scalar_lea.vmem (!%p6209_p10), [#allocation2], %s5625_s0 }
 0x147   : > { %5080 = dma.done.wait (%p6210_p1), %s783_s7, 128  }
 0x148   : > { %5082 = vsyncadd (%p6210_p1), %s783_s7, 4294967168  ;;  %s791_s9 = sand.u32 1, %s5288_s23   ;;  %s795_s12 = scalar_lea.vmem [#allocation5], %s5625_s0 }
 0x149   : > { %s792_s1 = scalar_lea.sflag [#allocation6], %s791_s9 }
 0x14a   : > { %5084 = dma.done.wait (%p6210_p1), %s792_s1, 256  }
 0x14b   : > { %5086 = vsyncadd (%p6210_p1), %s792_s1, 4294967040  ;;  %s804_s4 = scalar_lea.vmem [#allocation7], %s5625_s0  ;;  %p6211_p6 = scmp.eq.s32.totalorder %s5288_s23, 0 }
 0x14d   : > { %5088 = dma.done.wait (%p6211_p6), [#allocation9], 6144   ;;  %p6212_p13 = pmov %p6211_p6 }
 0x14e   : > { %p6213_p5 = pmov %p6211_p6 }
 0x14f   : > { %5090 = vsyncadd (%p6212_p13), [#allocation9], 4294961152 }
 0x150   : > { %5092 = dma.done.wait (%p6213_p5), [#allocation12], 6144   ;;  %p6214_p9 = pmov %p6213_p5 }
 0x151   : > { %p6215_p11 = pmov %p6213_p5 }
 0x152   : > { %5094 = vsyncadd (%p6214_p9), [#allocation12], 4294961152 }
 0x153   : > { %5096 = dma.done.wait (%p6215_p11), [#allocation15], 6144   ;;  %p6216_p3 = pmov %p6213_p5 }
 0x155   : > { %5098 = vsyncadd (%p6216_p3), [#allocation15], 4294961152  ;;  %p6217_p2 = pmov %p6216_p3 }
 0x157   : > { %5100 = dma.done.wait (%p6217_p2), [#allocation18], 2048   ;;  %p6218_p0 = pmov %p6217_p2 }
 0x158   : > { %v5145_v0 = vmov 0.0   ;;  %vm5146_vm0 = vmmov 0   ;;  %v4465_v1 = vld [vmem:[#allocation8] ss:$12 sps:$4 sm:$0xff]   ;;  %v4466_v2 = vld [vmem:[#allocation8 + $0x4] ss:$12 sps:$4 sm:$0xff]  }
 0x159   : > { %5102 = vsyncadd (%p6218_p0), [#allocation18], 4294965248  ;;  %3920 = vmatprep.subr.bf16.mxu0 %v5145_v0  ;;  %3960 = vmatprep.subr.bf16.mxu1 %v5145_v0  ;;  %v4467_v3 = vld [vmem:[#allocation8 + $0x18] ss:$12 sps:$4 sm:$0xff]   ;;  %v4468_v4 = vld [vmem:[#allocation8 + $0x1c] ss:$12 sps:$4 sm:$0xff]  }
 0x15a   : > { %3936 = vmatprep.mubr.msk.bf16.mxu0 %vm5146_vm0, %v5145_v0  ;;  %3976 = vmatprep.mubr.msk.bf16.mxu1 %vm5146_vm0, %v5145_v0  ;;  %v4469_v5 = vld [vmem:[#allocation8 + $0x30] ss:$12 sps:$4 sm:$0xff]   ;;  %v4470_v6 = vld [vmem:[#allocation8 + $0x34] ss:$12 sps:$4 sm:$0xff]   ;;  %v4472_v8 = vld [vmem:[#allocation8 + $0x4c] ss:$12 sps:$4 sm:$0xff]  }
 0x15b   : > { %3921 = vmatpush3.bf16.msra.mxu0 %v4465_v1  ;;  %3961 = vmatpush3.bf16.msra.mxu1 %v4466_v2  ;;  %v4471_v7 = vld [vmem:[#allocation8 + $0x48] ss:$12 sps:$4 sm:$0xff]   ;;  %p926_p8 = scmp.lt.s32.totalorder %s5288_s23, 1  ;;  %v4473_v9 = vld [vmem:[#allocation8 + $0x60] ss:$12 sps:$4 sm:$0xff]   ;;  %s6219_s16 = sld [smem:[#allocation40_spill]] }
 0x15c   : > { %3922 = vmatprep.subr.bf16.mxu0 %v5145_v0  ;;  %3962 = vmatprep.subr.bf16.mxu1 %v5145_v0  ;;  %v4474_v10 = vld [vmem:[#allocation8 + $0x64] ss:$12 sps:$4 sm:$0xff]   ;;  %v4476_v12 = vld [vmem:[#allocation8 + $0x7c] ss:$12 sps:$4 sm:$0xff]   ;;  %v4478_v14 = vld [vmem:[#allocation8 + $0x94] ss:$12 sps:$4 sm:$0xff]  }
 0x15d   : > { %s5674_s26 = scalar_select %p926_p8, %s5288_s23, 1  ;;  %v4475_v11 = vld [vmem:[#allocation8 + $0x78] ss:$12 sps:$4 sm:$0xff]   ;;  %v4477_v13 = vld [vmem:[#allocation8 + $0x90] ss:$12 sps:$4 sm:$0xff]  }
 0x15e   : > { %v4479_v15 = vld [vmem:[#allocation8 + $0xa8] ss:$12 sps:$4 sm:$0xff]   ;;  %v4480_v17 = vld [vmem:[#allocation8 + $0xac] ss:$12 sps:$4 sm:$0xff]   ;;  %v4482_v20 = vld [vmem:[#allocation10 + $0x4] ss:$12 sps:$4 sm:$0xff]  }
 0x15f   : > { %3923 = vmatpush3.bf16.msra.mxu0 %v4467_v3  ;;  %3963 = vmatpush3.bf16.msra.mxu1 %v4468_v4  ;;  %s6155_s20 = sshll.u32 %s5674_s26, 3  ;;  %v4481_v19 = vld [vmem:[#allocation10] ss:$12 sps:$4 sm:$0xff]   ;;  %v4483_v21 = vld [vmem:[#allocation10 + $0x18] ss:$12 sps:$4 sm:$0xff]   ;;  %s6220_s22 = sld [smem:[#allocation46_spill]] }
 0x160   : > { %3924 = vmatprep.subr.bf16.mxu0 %v5145_v0  ;;  %3964 = vmatprep.subr.bf16.mxu1 %v5145_v0  ;;  %v4484_v22 = vld [vmem:[#allocation10 + $0x1c] ss:$12 sps:$4 sm:$0xff]   ;;  %v4486_v24 = vld [vmem:[#allocation10 + $0x34] ss:$12 sps:$4 sm:$0xff]   ;;  %v4488_v26 = vld [vmem:[#allocation10 + $0x4c] ss:$12 sps:$4 sm:$0xff]  }
 0x161   : > { %s929_s19 = scalar_lea.vmem %s6219_s16, %s6155_s20  ;;  %v4485_v23 = vld [vmem:[#allocation10 + $0x30] ss:$12 sps:$4 sm:$0xff]   ;;  %v4487_v25 = vld [vmem:[#allocation10 + $0x48] ss:$12 sps:$4 sm:$0xff]   ;;  %v4489_v27 = vld [vmem:[#allocation10 + $0x60] ss:$12 sps:$4 sm:$0xff]  }
 0x162   : > { %v935_v16 = vld [vmem:[%s929_s19] sm:$0xff]  ;;  %v4491_v29 = vld [vmem:[#allocation10 + $0x78] ss:$12 sps:$4 sm:$0xff]   ;;  %v4492_v30 = vld [vmem:[#allocation10 + $0x7c] ss:$12 sps:$4 sm:$0xff]   ;;  %s6221_s8 = sld [smem:[#allocation48_spill]] }
 0x163   : > { %3925 = vmatpush3.bf16.msra.mxu0 %v4469_v5  ;;  %3965 = vmatpush3.bf16.msra.mxu1 %v4470_v6  ;;  %v5688_v18 = vpack.c.bf16 %v935_v16, %v935_v16  ;;  %v4490_v28 = vld [vmem:[#allocation10 + $0x64] ss:$12 sps:$4 sm:$0xff]   ;;  %v4494_v32 = vld [vmem:[#allocation10 + $0x94] ss:$12 sps:$4 sm:$0xff]   ;;  %v4496_v35 = vld [vmem:[#allocation10 + $0xac] ss:$12 sps:$4 sm:$0xff]  }
 0x164   : > { %3926 = vmatprep.subr.bf16.mxu0 %v5145_v0  ;;  %3966 = vmatprep.subr.bf16.mxu1 %v5145_v0  ;;  %v4493_v31 = vld [vmem:[#allocation10 + $0x90] ss:$12 sps:$4 sm:$0xff]   ;;  %v4495_v33 = vld [vmem:[#allocation10 + $0xa8] ss:$12 sps:$4 sm:$0xff]   ;;  %v4499_v39 = vld [vmem:[#allocation8 + $0x20] ss:$12 sps:$4 sm:$0xff]  }
 0x165   : > { %v5712_v34 = vld [vmem:[%s786_s13] sm:$0xff]  ;;  %v4500_v40 = vld [vmem:[#allocation10 + $0x20] ss:$12 sps:$4 sm:$0xff]   ;;  %s911_s16 = scalar_lea.vmem [#allocation20], %s5625_s0  ;;  %s6222_s18 = sld [smem:[#allocation50_spill]] }
 0x166   : > { %v4497_v36 = vld [vmem:[#allocation8 + $0x8] ss:$12 sps:$4 sm:$0xff]   ;;  %v938_v37 = vpack.c.bf16 %v5712_v34, %v5712_v34  ;;  %v4501_v41 = vld [vmem:[#allocation8 + $0x38] ss:$12 sps:$4 sm:$0xff]   ;;  %v4503_v43 = vld [vmem:[#allocation8 + $0x50] ss:$12 sps:$4 sm:$0xff]  }
 0x167   : > { %3927 = vmatpush3.bf16.msra.mxu0 %v4471_v7  ;;  %3967 = vmatpush3.bf16.msra.mxu1 %v4472_v8  ;;  %v4498_v38 = vld [vmem:[#allocation10 + $0x8] ss:$12 sps:$4 sm:$0xff]   ;;  %v4502_v42 = vld [vmem:[#allocation10 + $0x38] ss:$12 sps:$4 sm:$0xff]   ;;  %v4504_v44 = vld [vmem:[#allocation10 + $0x50] ss:$12 sps:$4 sm:$0xff]  }
 0x168   : > { %3928 = vmatprep.subr.bf16.mxu0 %v5145_v0  ;;  %3968 = vmatprep.subr.bf16.mxu1 %v5145_v0  ;;  %v4505_v45 = vld [vmem:[#allocation8 + $0x68] ss:$12 sps:$4 sm:$0xff]   ;;  %v4507_v47 = vld [vmem:[#allocation8 + $0x80] ss:$12 sps:$4 sm:$0xff]   ;;  %v4509_v49 = vld [vmem:[#allocation8 + $0x98] ss:$12 sps:$4 sm:$0xff]  }
 0x169   : > { %v4506_v46 = vld [vmem:[#allocation10 + $0x68] ss:$12 sps:$4 sm:$0xff]   ;;  %v4508_v48 = vld [vmem:[#allocation10 + $0x80] ss:$12 sps:$4 sm:$0xff]   ;;  %v4510_v50 = vld [vmem:[#allocation10 + $0x98] ss:$12 sps:$4 sm:$0xff]  }
 0x16a   : > { %v4511_v51 = vld [vmem:[#allocation8 + $0xb0] ss:$12 sps:$4 sm:$0xff]   ;;  %v4513_v53 = vld [vmem:[#allocation11] ss:$12 sps:$4 sm:$0xff]   ;;  %v4515_v55 = vld [vmem:[#allocation11 + $0x18] ss:$12 sps:$4 sm:$0xff]  }
 0x16b   : > { %3929 = vmatpush3.bf16.msra.mxu0 %v4473_v9  ;;  %3969 = vmatpush3.bf16.msra.mxu1 %v4474_v10  ;;  %v4512_v52 = vld [vmem:[#allocation10 + $0xb0] ss:$12 sps:$4 sm:$0xff]   ;;  %v4518_v58 = vld [vmem:[#allocation11 + $0x34] ss:$12 sps:$4 sm:$0xff]   ;;  %v4520_v60 = vld [vmem:[#allocation11 + $0x4c] ss:$12 sps:$4 sm:$0xff]  }
 0x16c   : > { %3930 = vmatprep.subr.bf16.mxu0 %v5145_v0  ;;  %3970 = vmatprep.subr.bf16.mxu1 %v5145_v0  ;;  %v4514_v54 = vld [vmem:[#allocation11 + $0x4] ss:$12 sps:$4 sm:$0xff]   ;;  %v4516_v56 = vld [vmem:[#allocation11 + $0x1c] ss:$12 sps:$4 sm:$0xff]   ;;  %v4521_v61 = vld [vmem:[#allocation11 + $0x60] ss:$12 sps:$4 sm:$0xff]  }
 0x16d   : > { %v4517_v57 = vld [vmem:[#allocation11 + $0x30] ss:$12 sps:$4 sm:$0xff]   ;;  %v4519_v59 = vld [vmem:[#allocation11 + $0x48] ss:$12 sps:$4 sm:$0xff]   ;;  %v4523_v63 = vld [vmem:[#allocation11 + $0x78] ss:$12 sps:$4 sm:$0xff]  }
 0x16e   : > { %v4522_v62 = vld [vmem:[#allocation11 + $0x64] ss:$12 sps:$4 sm:$0xff]   ;;  %v4524_v1 = vld [vmem:[#allocation11 + $0x7c] ss:$12 sps:$4 sm:$0xff]   ;;  %v4526_v3 = vld [vmem:[#allocation11 + $0x94] ss:$12 sps:$4 sm:$0xff]  }
 0x16f   : > { %3931 = vmatpush3.bf16.msra.mxu0 %v4475_v11  ;;  %3971 = vmatpush3.bf16.msra.mxu1 %v4476_v12  ;;  %v4525_v2 = vld [vmem:[#allocation11 + $0x90] ss:$12 sps:$4 sm:$0xff]   ;;  %v4527_v4 = vld [vmem:[#allocation11 + $0xa8] ss:$12 sps:$4 sm:$0xff]   ;;  %v4528_v5 = vld [vmem:[#allocation11 + $0xac] ss:$12 sps:$4 sm:$0xff]  }
 0x170   : > { %3932 = vmatprep.subr.bf16.mxu0 %v5145_v0  ;;  %3972 = vmatprep.subr.bf16.mxu1 %v5145_v0  ;;  %v3564_v6 = vld [vmem:[%s6220_s22] ss:$0 sm:$0xff]  ;;  %s6223_s24 = sld [smem:[#allocation51_spill]]  ;;  %s6224_s25 = sld [smem:[#allocation53_spill]] }
 0x171   : > { %v3573_v7 = vld [vmem:[%s6221_s8] ss:$0 sm:$0xff]  ;;  %s6225_s14 = sld [smem:[#allocation54_spill]]  ;;  %s6226_s5 = sld [smem:[#allocation38_spill]] }
 0x172   : > { %v4280_v8 = vadd.f32 %v3573_v7, %v3564_v6  ;;  %v4546_v6 = vld [vmem:[#allocation13 + $0x8] ss:$12 sps:$4 sm:$0xff]   ;;  %v4547_v7 = vld [vmem:[#allocation11 + $0x20] ss:$12 sps:$4 sm:$0xff]   ;;  %s6156_s27 = scalar_lea.vmem [#allocation23], %s5625_s0  ;;  %s5948_s21 = sshll.u32 %s5288_s23, 7 }
 0x173   : > { %3933 = vmatpush3.bf16.msra.mxu0 %v4477_v13  ;;  %3973 = vmatpush3.bf16.msra.mxu1 %v4478_v14  ;;  %s6227_s1 = sld [smem:[#allocation57_spill]]  ;;  %s3208_s3 = sshll.u32 %s911_s16, 4  ;;  %s3209_s3 = int_to_ptr.vmem [resolvable:$true] %s3208_s3 }
 0x174   : > { %3934 = vmatprep.subr.bf16.mxu0 %v5145_v0  ;;  %3974 = vmatprep.subr.bf16.mxu1 %v5145_v0  ;;  %s4951_s19 = scalar_lea.vmem %s3209_s3, 128  ;;  %s5148_s20 = smov [#allocation20]  }
 0x175   : > { %p4952_p4 = scmp.ne.s32.totalorder %s3209_s3, %s4951_s19 }
 0x177   : > { %3935 = vmatpush3.bf16.msra.mxu0 %v4479_v15  ;;  %3975 = vmatpush3.bf16.msra.mxu1 %v4480_v17  ;;  %v3583_v15 = vld [vmem:[%s6220_s22 + $0x1] ss:$0 sm:$0xff]  ;;  %p6228_p7 = scmp.ne.s32.totalorder %s6226_s5, 0 }
 0x178   : > { %3940 = vmatprep.subr.bf16.mxu0 %v5145_v0  ;;  %3980 = vmatprep.subr.bf16.mxu1 %v5145_v0 }
 0x179   : > { %s5954_s30 = scalar_lea.hbm %s6227_s1, %s5948_s21  ;;  %p4953_p12 = pnand %p4952_p4, %p6228_p7 }
 0x17a   : > { %3937 = vmatmul.mubr.bf16.vlgmr.msra.gmra.mrb[0].mxu0 %v5688_v18  ;;  %3977 = vmatmul.mubr.bf16.vlgmr.msra.gmra.mrb[0].mxu1 %v5688_v18 }
 0x17b   : > { %3941 = vmatpush3.bf16.msra.mxu0 %v4481_v19  ;;  %3981 = vmatpush3.bf16.msra.mxu1 %v4482_v20  ;;  %v3592_v19 = vld [vmem:[%s6221_s8 + $0x1] ss:$0 sm:$0xff]  ;;  %p4954_p10 = pneg %p4953_p12 }
 0x17c   : > { %3942 = vmatprep.subr.bf16.mxu0 %v5145_v0  ;;  %3982 = vmatprep.subr.bf16.mxu1 %v5145_v0 }
 0x17d   : > { %3956 = vmatprep.mubr.msk.bf16.mxu0 %vm5146_vm0, %v5145_v0  ;;  %3996 = vmatprep.mubr.msk.bf16.mxu1 %vm5146_vm0, %v5145_v0 }
 0x17f   : > { %3943 = vmatpush3.bf16.msra.mxu0 %v4483_v21  ;;  %3983 = vmatpush3.bf16.msra.mxu1 %v4484_v22  ;;  %v4282_v21 = vadd.f32 %v3592_v19, %v3583_v15  ;;  %v4555_v15 = vld [vmem:[#allocation11 + $0x80] ss:$12 sps:$4 sm:$0xff]   ;;  %v4559_v19 = vld [vmem:[#allocation11 + $0xb0] ss:$12 sps:$4 sm:$0xff]  }
 0x180   : > { %3944 = vmatprep.subr.bf16.mxu0 %v5145_v0  ;;  %3984 = vmatprep.subr.bf16.mxu1 %v5145_v0 }
 0x183   : > { %3945 = vmatpush3.bf16.msra.mxu0 %v4485_v23  ;;  %3985 = vmatpush3.bf16.msra.mxu1 %v4486_v24 }
 0x184   : > { %3946 = vmatprep.subr.bf16.mxu0 %v5145_v0  ;;  %3986 = vmatprep.subr.bf16.mxu1 %v5145_v0 }
 0x187   : > { %3947 = vmatpush3.bf16.msra.mxu0 %v4487_v25  ;;  %3987 = vmatpush3.bf16.msra.mxu1 %v4488_v26 }
 0x188   : > { %3948 = vmatprep.subr.bf16.mxu0 %v5145_v0  ;;  %3988 = vmatprep.subr.bf16.mxu1 %v5145_v0 }
 0x18b   : > { %3949 = vmatpush3.bf16.msra.mxu0 %v4489_v27  ;;  %3989 = vmatpush3.bf16.msra.mxu1 %v4490_v28  ;;  %v3602_v27 = vld [vmem:[%s6220_s22 + $0x2] ss:$0 sm:$0xff] }
 0x18c   : > { %3950 = vmatprep.subr.bf16.mxu0 %v5145_v0  ;;  %3990 = vmatprep.subr.bf16.mxu1 %v5145_v0  ;;  %v3611_v28 = vld [vmem:[%s6221_s8 + $0x2] ss:$0 sm:$0xff] }
 0x18f   : > { %3951 = vmatpush3.bf16.msra.mxu0 %v4491_v29  ;;  %3991 = vmatpush3.bf16.msra.mxu1 %v4492_v30 }
 0x190   : > { %3952 = vmatprep.subr.bf16.mxu0 %v5145_v0  ;;  %3992 = vmatprep.subr.bf16.mxu1 %v5145_v0 }
 0x193   : > { %3953 = vmatpush3.bf16.msra.mxu0 %v4493_v31  ;;  %3993 = vmatpush3.bf16.msra.mxu1 %v4494_v32 }
 0x194   : > { %3954 = vmatprep.subr.bf16.mxu0 %v5145_v0  ;;  %3994 = vmatprep.subr.bf16.mxu1 %v5145_v0 }
 0x197   : > { %3955 = vmatpush3.bf16.msra.mxu0 %v4495_v33  ;;  %3995 = vmatpush3.bf16.msra.mxu1 %v4496_v35 }
 0x198   : > { %4000 = vmatprep.subr.bf16.mxu0 %v5145_v0  ;;  %4020 = vmatprep.subr.bf16.mxu1 %v5145_v0 }
 0x19a   : > { %3957 = vmatmul.mubr.bf16.vlgmr.msra.gmra.mrb[0].mxu0 %v938_v37  ;;  %3997 = vmatmul.mubr.bf16.vlgmr.msra.gmra.mrb[0].mxu1 %v938_v37 }
 0x19b   : > { %4001 = vmatpush3.bf16.msra.mxu0 %v4497_v36  ;;  %4021 = vmatpush3.bf16.msra.mxu1 %v4498_v38 }
 0x19c   : > { %4002 = vmatprep.subr.bf16.mxu0 %v5145_v0  ;;  %4022 = vmatprep.subr.bf16.mxu1 %v5145_v0 }
 0x19d   : > { %4016 = vmatprep.mubr.msk.bf16.mxu0 %vm5146_vm0, %v5145_v0  ;;  %4036 = vmatprep.mubr.msk.bf16.mxu1 %vm5146_vm0, %v5145_v0 }
 0x19f   : > { %4003 = vmatpush3.bf16.msra.mxu0 %v4499_v39  ;;  %4023 = vmatpush3.bf16.msra.mxu1 %v4500_v40 }
 0x1a0   : > { %4004 = vmatprep.subr.bf16.mxu0 %v5145_v0  ;;  %4024 = vmatprep.subr.bf16.mxu1 %v5145_v0 }
 0x1a3   : > { %4005 = vmatpush3.bf16.msra.mxu0 %v4501_v41  ;;  %4025 = vmatpush3.bf16.msra.mxu1 %v4502_v42 }
 0x1a4   : > { %4006 = vmatprep.subr.bf16.mxu0 %v5145_v0  ;;  %4026 = vmatprep.subr.bf16.mxu1 %v5145_v0 }
 0x1a7   : > { %4007 = vmatpush3.bf16.msra.mxu0 %v4503_v43  ;;  %4027 = vmatpush3.bf16.msra.mxu1 %v4504_v44 }
 0x1a8   : > { %4008 = vmatprep.subr.bf16.mxu0 %v5145_v0  ;;  %4028 = vmatprep.subr.bf16.mxu1 %v5145_v0 }
 0x1ab   : > { %4009 = vmatpush3.bf16.msra.mxu0 %v4505_v45  ;;  %4029 = vmatpush3.bf16.msra.mxu1 %v4506_v46 }
 0x1ac   : > { %4010 = vmatprep.subr.bf16.mxu0 %v5145_v0  ;;  %4030 = vmatprep.subr.bf16.mxu1 %v5145_v0 }
 0x1af   : > { %4011 = vmatpush3.bf16.msra.mxu0 %v4507_v47  ;;  %4031 = vmatpush3.bf16.msra.mxu1 %v4508_v48 }
 0x1b0   : > { %4012 = vmatprep.subr.bf16.mxu0 %v5145_v0  ;;  %4032 = vmatprep.subr.bf16.mxu1 %v5145_v0 }
 0x1b3   : > { %4013 = vmatpush3.bf16.msra.mxu0 %v4509_v49  ;;  %4033 = vmatpush3.bf16.msra.mxu1 %v4510_v50  ;;  %v4529_v50 = vld [vmem:[#allocation13] ss:$12 sps:$4 sm:$0xff]  }
 0x1b4   : > { %4014 = vmatprep.subr.bf16.mxu0 %v5145_v0  ;;  %4034 = vmatprep.subr.bf16.mxu1 %v5145_v0 }
 0x1b7   : > { %4015 = vmatpush3.bf16.msra.mxu0 %v4511_v51  ;;  %4035 = vmatpush3.bf16.msra.mxu1 %v4512_v52  ;;  %v4530_v51 = vld [vmem:[#allocation13 + $0x4] ss:$12 sps:$4 sm:$0xff]  }
 0x1b8   : > { %4040 = vmatprep.subr.bf16.mxu0 %v5145_v0  ;;  %4080 = vmatprep.subr.bf16.mxu1 %v5145_v0 }
 0x1ba   : > { %4017 = vmatmul.mubr.bf16.vlgmr.msra.gmra.mrb[4].mxu0 %v5688_v18  ;;  %4037 = vmatmul.mubr.bf16.vlgmr.msra.gmra.mrb[4].mxu1 %v938_v37 }
 0x1bb   : > { %4056 = vmatprep.mubr.msk.bf16.mxu0 %vm5146_vm0, %v5145_v0  ;;  %4096 = vmatprep.mubr.msk.bf16.mxu1 %vm5146_vm0, %v5145_v0 }
 0x1bc   : > { %4041 = vmatpush3.bf16.msra.mxu0 %v4513_v53  ;;  %4081 = vmatpush3.bf16.msra.mxu1 %v4514_v54  ;;  %v4531_v53 = vld [vmem:[#allocation13 + $0x18] ss:$12 sps:$4 sm:$0xff]   ;;  %v4532_v54 = vld [vmem:[#allocation13 + $0x1c] ss:$12 sps:$4 sm:$0xff]  }
 0x1bd   : > { %4042 = vmatprep.subr.bf16.mxu0 %v5145_v0  ;;  %4082 = vmatprep.subr.bf16.mxu1 %v5145_v0 }
 0x1c0   : > { %4043 = vmatpush3.bf16.msra.mxu0 %v4515_v55  ;;  %4083 = vmatpush3.bf16.msra.mxu1 %v4516_v56  ;;  %v4534_v55 = vld [vmem:[#allocation13 + $0x34] ss:$12 sps:$4 sm:$0xff]  }
 0x1c1   : > { %4044 = vmatprep.subr.bf16.mxu0 %v5145_v0  ;;  %4084 = vmatprep.subr.bf16.mxu1 %v5145_v0  ;;  %v4535_v56 = vld [vmem:[#allocation13 + $0x48] ss:$12 sps:$4 sm:$0xff]  }
 0x1c4   : > { %4045 = vmatpush3.bf16.msra.mxu0 %v4517_v57  ;;  %4085 = vmatpush3.bf16.msra.mxu1 %v4518_v58  ;;  %v4536_v57 = vld [vmem:[#allocation13 + $0x4c] ss:$12 sps:$4 sm:$0xff]  }
 0x1c5   : > { %4046 = vmatprep.subr.bf16.mxu0 %v5145_v0  ;;  %4086 = vmatprep.subr.bf16.mxu1 %v5145_v0  ;;  %v4537_v58 = vld [vmem:[#allocation13 + $0x60] ss:$12 sps:$4 sm:$0xff]  }
 0x1c8   : > { %4047 = vmatpush3.bf16.msra.mxu0 %v4519_v59  ;;  %4087 = vmatpush3.bf16.msra.mxu1 %v4520_v60  ;;  %v4538_v59 = vld [vmem:[#allocation13 + $0x64] ss:$12 sps:$4 sm:$0xff]  }
 0x1c9   : > { %4048 = vmatprep.subr.bf16.mxu0 %v5145_v0  ;;  %4088 = vmatprep.subr.bf16.mxu1 %v5145_v0  ;;  %v4539_v60 = vld [vmem:[#allocation13 + $0x78] ss:$12 sps:$4 sm:$0xff]  }
 0x1cc   : > { %4049 = vmatpush3.bf16.msra.mxu0 %v4521_v61  ;;  %4089 = vmatpush3.bf16.msra.mxu1 %v4522_v62  ;;  %v4540_v61 = vld [vmem:[#allocation13 + $0x7c] ss:$12 sps:$4 sm:$0xff]  }
 0x1cd   : > { %4050 = vmatprep.subr.bf16.mxu0 %v5145_v0  ;;  %4090 = vmatprep.subr.bf16.mxu1 %v5145_v0  ;;  %v4541_v62 = vld [vmem:[#allocation13 + $0x90] ss:$12 sps:$4 sm:$0xff]  }
 0x1d0   : > { %4051 = vmatpush3.bf16.msra.mxu0 %v4523_v63  ;;  %4091 = vmatpush3.bf16.msra.mxu1 %v4524_v1  ;;  %v4542_v63 = vld [vmem:[#allocation13 + $0x94] ss:$12 sps:$4 sm:$0xff]  }
 0x1d1   : > { %4052 = vmatprep.subr.bf16.mxu0 %v5145_v0  ;;  %4092 = vmatprep.subr.bf16.mxu1 %v5145_v0  ;;  %v4543_v1 = vld [vmem:[#allocation13 + $0xa8] ss:$12 sps:$4 sm:$0xff]  }
 0x1d4   : > { %4053 = vmatpush3.bf16.msra.mxu0 %v4525_v2  ;;  %4093 = vmatpush3.bf16.msra.mxu1 %v4526_v3  ;;  %v4544_v2 = vld [vmem:[#allocation13 + $0xac] ss:$12 sps:$4 sm:$0xff]  }
 0x1d5   : > { %4054 = vmatprep.subr.bf16.mxu0 %v5145_v0  ;;  %4094 = vmatprep.subr.bf16.mxu1 %v5145_v0  ;;  %v5805_v3 = vld [vmem:[%s795_s12] sm:$0xff]  ;;  %s6157_s12 = scalar_lea.vmem [#allocation22], %s5625_s0 }
 0x1d8   : > { %4055 = vmatpush3.bf16.msra.mxu0 %v4527_v4  ;;  %4095 = vmatpush3.bf16.msra.mxu1 %v4528_v5  ;;  %v1629_v4 = vpack.c.bf16 %v5805_v3, %v5805_v3  ;;  %v4545_v5 = vld [vmem:[#allocation11 + $0x8] ss:$12 sps:$4 sm:$0xff]  }
 0x1d9   : > { %4060 = vmatprep.subr.bf16.mxu0 %v5145_v0  ;;  %4100 = vmatprep.subr.bf16.mxu1 %v5145_v0 }
 0x26d   : > { %v1155_v9 = vpop.f32.mrb[0].mxu0  ;;  %v1384_v11 = vpop.f32.mrb[0].mxu1 }
 0x26e   : > { %v4281_v10 = vadd.f32 %v4280_v8, %v1155_v9  ;;  %v3958_v12 = vpop.f32.mrb[1].mxu0  ;;  %v3998_v13 = vpop.f32.mrb[1].mxu1  ;;  %v4283_v22 = vadd.f32 %v4282_v21, %v1384_v11  ;;  %v4548_v8 = vld [vmem:[#allocation13 + $0x20] ss:$12 sps:$4 sm:$0xff]   ;;  %v4549_v9 = vld [vmem:[#allocation11 + $0x38] ss:$12 sps:$4 sm:$0xff]  }
 0x26f   : > { %v1158_v14 = vpop.f32.mrb[2].mxu0  ;;  %v1387_v16 = vpop.f32.mrb[2].mxu1  ;;  %v4551_v11 = vld [vmem:[#allocation11 + $0x50] ss:$12 sps:$4 sm:$0xff]   ;;  %v4553_v13 = vld [vmem:[#allocation11 + $0x68] ss:$12 sps:$4 sm:$0xff]  }
 0x270   : > { %v3959_v17 = vpop.f32.mrb[3].mxu0  ;;  %v3582_v18 = vmul.f32 -1.442695, %v4281_v10  ;;  %v3999_v20 = vpop.f32.mrb[3].mxu1  ;;  %v3601_v23 = vmul.f32 -1.442695, %v4283_v22 }
 0x271   : > { %v4550_v10 = vld [vmem:[#allocation13 + $0x38] ss:$12 sps:$4 sm:$0xff]   ;;  %v4552_v12 = vld [vmem:[#allocation13 + $0x50] ss:$12 sps:$4 sm:$0xff]   ;;  %v4554_v14 = vld [vmem:[#allocation13 + $0x68] ss:$12 sps:$4 sm:$0xff]  }
 0x272   : > { %4633 = vpow2.f32 %v3582_v18  ;;  %v4556_v16 = vld [vmem:[#allocation13 + $0x80] ss:$12 sps:$4 sm:$0xff]   ;;  %v4557_v17 = vld [vmem:[#allocation11 + $0x98] ss:$12 sps:$4 sm:$0xff]   ;;  %v4560_v20 = vld [vmem:[#allocation13 + $0xb0] ss:$12 sps:$4 sm:$0xff]  }
 0x273   : > { %4635 = vpow2.f32 %v3601_v23  ;;  %v4558_v18 = vld [vmem:[#allocation13 + $0x98] ss:$12 sps:$4 sm:$0xff]   ;;  %v4561_v21 = vld [vmem:[#allocation14] ss:$12 sps:$4 sm:$0xff]  }
 0x274   : > { %v4562_v22 = vld [vmem:[#allocation14 + $0x4] ss:$12 sps:$4 sm:$0xff]  }
 0x275   : > { %v4563_v23 = vld [vmem:[#allocation14 + $0x18] ss:$12 sps:$4 sm:$0xff]  }
 0x27c   : > { %v4634_v24 = vpop.eup %4633 }
 0x27d   : > { %v1165_v25 = vadd.f32 1.0, %v4634_v24  ;;  %v4636_v26 = vpop.eup %4635  ;;  %v4564_v24 = vld [vmem:[#allocation14 + $0x1c] ss:$12 sps:$4 sm:$0xff]  }
 0x27e   : > { %v1394_v29 = vadd.f32 1.0, %v4636_v26  ;;  %v4566_v26 = vld [vmem:[#allocation14 + $0x34] ss:$12 sps:$4 sm:$0xff]  }
 0x27f   : > { %4637 = vrcp.f32 %v1165_v25  ;;  %v4565_v25 = vld [vmem:[#allocation14 + $0x30] ss:$12 sps:$4 sm:$0xff]  }
 0x280   : > { %4639 = vrcp.f32 %v1394_v29  ;;  %v4569_v29 = vld [vmem:[#allocation14 + $0x60] ss:$12 sps:$4 sm:$0xff]  }
 0x289   : > { %v4638_v38 = vpop.eup %4637 }
 0x28a   : > { %v4640_v44 = vpop.eup %4639 }
 0x28b   : > { %v1622_v45 = vsub.f32 1.0, %v4640_v44  ;;  %v1624_v48 = vmul.f32 %v4640_v44, %v5712_v34  ;;  %v4533_v34 = vld [vmem:[#allocation13 + $0x30] ss:$12 sps:$4 sm:$0xff]  }
 0x28d   : > { %v1502_v30 = vpop.f32.mrb[4].mxu0  ;;  %v1613_v31 = vpop.f32.mrb[4].mxu1 }
 0x28e   : > { %v4018_v32 = vpop.f32.mrb[5].mxu0  ;;  %v1503_v33 = vadd.f32 %v3602_v27, %v1502_v30  ;;  %v1614_v35 = vadd.f32 %v3611_v28, %v1613_v31  ;;  %v4038_v36 = vpop.f32.mrb[5].mxu1  ;;  %v4567_v27 = vld [vmem:[#allocation14 + $0x48] ss:$12 sps:$4 sm:$0xff]   ;;  %v4568_v28 = vld [vmem:[#allocation14 + $0x4c] ss:$12 sps:$4 sm:$0xff]  }
 0x28f   : > { %v1505_v37 = vpop.f32.mrb[6].mxu0  ;;  %v1616_v39 = vpop.f32.mrb[6].mxu1  ;;  %v4570_v30 = vld [vmem:[#allocation14 + $0x64] ss:$12 sps:$4 sm:$0xff]   ;;  %v4572_v32 = vld [vmem:[#allocation14 + $0x7c] ss:$12 sps:$4 sm:$0xff]  }
 0x290   : > { %v4019_v40 = vpop.f32.mrb[7].mxu0  ;;  %v1619_v41 = vmul.f32 %v4638_v38, %v1614_v35  ;;  %v4039_v42 = vpop.f32.mrb[7].mxu1  ;;  %v4571_v31 = vld [vmem:[#allocation14 + $0x78] ss:$12 sps:$4 sm:$0xff]   ;;  %v4574_v35 = vld [vmem:[#allocation14 + $0x94] ss:$12 sps:$4 sm:$0xff]  }
 0x291   : > { %v4575_v36 = vld [vmem:[#allocation14 + $0xa8] ss:$12 sps:$4 sm:$0xff]   ;;  %v4576_v37 = vld [vmem:[#allocation14 + $0xac] ss:$12 sps:$4 sm:$0xff]   ;;  %v3620_v38 = vld [vmem:[%s6222_s18] ss:$0 sm:$0xff] }
 0x292   : > { %v1620_v43 = vadd.f32 %v1619_v41, %v1503_v33  ;;  %v4573_v33 = vld [vmem:[#allocation14 + $0x90] ss:$12 sps:$4 sm:$0xff]  }
 0x293   : > { %v3629_v39 = vld [vmem:[%s6223_s24] ss:$0 sm:$0xff] }
 0x294   : > { %4641 = vtanh.f32 %v1620_v43  ;;  %v4284_v40 = vadd.f32 %v3629_v39, %v3620_v38  ;;  %v4594_v38 = vld [vmem:[#allocation16 + $0x8] ss:$12 sps:$4 sm:$0xff]   ;;  %v4595_v39 = vld [vmem:[#allocation14 + $0x20] ss:$12 sps:$4 sm:$0xff]  }
 0x29e   : > { %v4642_v46 = vpop.eup %4641 }
 0x29f   : > { %v1623_v47 = vmul.f32 %v4642_v46, %v1622_v45  ;;  %v3639_v46 = vld [vmem:[%s6222_s18 + $0x1] ss:$0 sm:$0xff] }
 0x2a1   : > { %v1625_v49 = vadd.f32 %v1624_v48, %v1623_v47 }
 0x2a3   : > { %v5780_v52 = vpack.c.bf16 %v1625_v49, %v1625_v49  ;;  %1626 = vst [vmem:[%s911_s16] sm:$0xff] %v1625_v49 }
 0x2a5   : > { %4057 = vmatmul.mubr.bf16.vlgmr.msra.gmra.mrb[8].mxu0 %v5780_v52  ;;  %4097 = vmatmul.mubr.bf16.vlgmr.msra.gmra.mrb[8].mxu1 %v5780_v52 }
 0x2a6   : > { %4061 = vmatpush3.bf16.msra.mxu0 %v4529_v50  ;;  %4101 = vmatpush3.bf16.msra.mxu1 %v4530_v51  ;;  %v3648_v50 = vld [vmem:[%s6223_s24 + $0x1] ss:$0 sm:$0xff] }
 0x2a7   : > { %4062 = vmatprep.subr.bf16.mxu0 %v5145_v0  ;;  %4102 = vmatprep.subr.bf16.mxu1 %v5145_v0 }
 0x2a8   : > { %4076 = vmatprep.mubr.msk.bf16.mxu0 %vm5146_vm0, %v5145_v0  ;;  %4116 = vmatprep.mubr.msk.bf16.mxu1 %vm5146_vm0, %v5145_v0 }
 0x2aa   : > { %4063 = vmatpush3.bf16.msra.mxu0 %v4531_v53  ;;  %4103 = vmatpush3.bf16.msra.mxu1 %v4532_v54  ;;  %v4286_v53 = vadd.f32 %v3648_v50, %v3639_v46  ;;  %v4602_v46 = vld [vmem:[#allocation16 + $0x68] ss:$12 sps:$4 sm:$0xff]   ;;  %v4606_v50 = vld [vmem:[#allocation16 + $0x98] ss:$12 sps:$4 sm:$0xff]  }
 0x2ab   : > { %4064 = vmatprep.subr.bf16.mxu0 %v5145_v0  ;;  %4104 = vmatprep.subr.bf16.mxu1 %v5145_v0 }
 0x2ae   : > { %4065 = vmatpush3.bf16.msra.mxu0 %v4533_v34  ;;  %4105 = vmatpush3.bf16.msra.mxu1 %v4534_v55 }
 0x2af   : > { %4066 = vmatprep.subr.bf16.mxu0 %v5145_v0  ;;  %4106 = vmatprep.subr.bf16.mxu1 %v5145_v0 }
 0x2b2   : > { %4067 = vmatpush3.bf16.msra.mxu0 %v4535_v56  ;;  %4107 = vmatpush3.bf16.msra.mxu1 %v4536_v57 }
 0x2b3   : > { %4068 = vmatprep.subr.bf16.mxu0 %v5145_v0  ;;  %4108 = vmatprep.subr.bf16.mxu1 %v5145_v0 }
 0x2b6   : > { %4069 = vmatpush3.bf16.msra.mxu0 %v4537_v58  ;;  %4109 = vmatpush3.bf16.msra.mxu1 %v4538_v59  ;;  %v3667_v58 = vld [vmem:[%s6223_s24 + $0x2] ss:$0 sm:$0xff] }
 0x2b7   : > { %4070 = vmatprep.subr.bf16.mxu0 %v5145_v0  ;;  %4110 = vmatprep.subr.bf16.mxu1 %v5145_v0 }
 0x2ba   : > { %4071 = vmatpush3.bf16.msra.mxu0 %v4539_v60  ;;  %4111 = vmatpush3.bf16.msra.mxu1 %v4540_v61  ;;  %v3658_v60 = vld [vmem:[%s6222_s18 + $0x2] ss:$0 sm:$0xff] }
 0x2bb   : > { %4072 = vmatprep.subr.bf16.mxu0 %v5145_v0  ;;  %4112 = vmatprep.subr.bf16.mxu1 %v5145_v0 }
 0x2be   : > { %4073 = vmatpush3.bf16.msra.mxu0 %v4541_v62  ;;  %4113 = vmatpush3.bf16.msra.mxu1 %v4542_v63 }
 0x2bf   : > { %4074 = vmatprep.subr.bf16.mxu0 %v5145_v0  ;;  %4114 = vmatprep.subr.bf16.mxu1 %v5145_v0 }
 0x2c2   : > { %4075 = vmatpush3.bf16.msra.mxu0 %v4543_v1  ;;  %4115 = vmatpush3.bf16.msra.mxu1 %v4544_v2 }
 0x2c3   : > { %4120 = vmatprep.subr.bf16.mxu0 %v5145_v0  ;;  %4140 = vmatprep.subr.bf16.mxu1 %v5145_v0 }
 0x2c5   : > { %4077 = vmatmul.mubr.bf16.vlgmr.msra.gmra.mrb[8].mxu0 %v1629_v4  ;;  %4117 = vmatmul.mubr.bf16.vlgmr.msra.gmra.mrb[8].mxu1 %v1629_v4 }
 0x2c6   : > { %4121 = vmatpush3.bf16.msra.mxu0 %v4545_v5  ;;  %4141 = vmatpush3.bf16.msra.mxu1 %v4546_v6 }
 0x2c7   : > { %4122 = vmatprep.subr.bf16.mxu0 %v5145_v0  ;;  %4142 = vmatprep.subr.bf16.mxu1 %v5145_v0 }
 0x2c8   : > { %4136 = vmatprep.mubr.msk.bf16.mxu0 %vm5146_vm0, %v5145_v0  ;;  %4156 = vmatprep.mubr.msk.bf16.mxu1 %vm5146_vm0, %v5145_v0 }
 0x2ca   : > { %4123 = vmatpush3.bf16.msra.mxu0 %v4547_v7  ;;  %4143 = vmatpush3.bf16.msra.mxu1 %v4548_v8 }
 0x2cb   : > { %4124 = vmatprep.subr.bf16.mxu0 %v5145_v0  ;;  %4144 = vmatprep.subr.bf16.mxu1 %v5145_v0 }
 0x2ce   : > { %4125 = vmatpush3.bf16.msra.mxu0 %v4549_v9  ;;  %4145 = vmatpush3.bf16.msra.mxu1 %v4550_v10 }
 0x2cf   : > { %4126 = vmatprep.subr.bf16.mxu0 %v5145_v0  ;;  %4146 = vmatprep.subr.bf16.mxu1 %v5145_v0 }
 0x2d2   : > { %4127 = vmatpush3.bf16.msra.mxu0 %v4551_v11  ;;  %4147 = vmatpush3.bf16.msra.mxu1 %v4552_v12 }
 0x2d3   : > { %4128 = vmatprep.subr.bf16.mxu0 %v5145_v0  ;;  %4148 = vmatprep.subr.bf16.mxu1 %v5145_v0 }
 0x2d6   : > { %4129 = vmatpush3.bf16.msra.mxu0 %v4553_v13  ;;  %4149 = vmatpush3.bf16.msra.mxu1 %v4554_v14 }
 0x2d7   : > { %4130 = vmatprep.subr.bf16.mxu0 %v5145_v0  ;;  %4150 = vmatprep.subr.bf16.mxu1 %v5145_v0 }
 0x2da   : > { %4131 = vmatpush3.bf16.msra.mxu0 %v4555_v15  ;;  %4151 = vmatpush3.bf16.msra.mxu1 %v4556_v16 }
 0x2db   : > { %4132 = vmatprep.subr.bf16.mxu0 %v5145_v0  ;;  %4152 = vmatprep.subr.bf16.mxu1 %v5145_v0 }
 0x2de   : > { %4133 = vmatpush3.bf16.msra.mxu0 %v4557_v17  ;;  %4153 = vmatpush3.bf16.msra.mxu1 %v4558_v18  ;;  %v4577_v18 = vld [vmem:[#allocation16] ss:$12 sps:$4 sm:$0xff]  }
 0x2df   : > { %4134 = vmatprep.subr.bf16.mxu0 %v5145_v0  ;;  %4154 = vmatprep.subr.bf16.mxu1 %v5145_v0 }
 0x2e2   : > { %4135 = vmatpush3.bf16.msra.mxu0 %v4559_v19  ;;  %4155 = vmatpush3.bf16.msra.mxu1 %v4560_v20  ;;  %v4578_v19 = vld [vmem:[#allocation16 + $0x4] ss:$12 sps:$4 sm:$0xff]  }
 0x2e3   : > { %4160 = vmatprep.subr.bf16.mxu0 %v5145_v0  ;;  %4200 = vmatprep.subr.bf16.mxu1 %v5145_v0 }
 0x2e5   : > { %4137 = vmatmul.mubr.bf16.vlgmr.msra.gmra.mrb[12].mxu0 %v5780_v52  ;;  %4157 = vmatmul.mubr.bf16.vlgmr.msra.gmra.mrb[12].mxu1 %v1629_v4 }
 0x2e6   : > { %4176 = vmatprep.mubr.msk.bf16.mxu0 %vm5146_vm0, %v5145_v0  ;;  %4216 = vmatprep.mubr.msk.bf16.mxu1 %vm5146_vm0, %v5145_v0 }
 0x2e7   : > { %4161 = vmatpush3.bf16.msra.mxu0 %v4561_v21  ;;  %4201 = vmatpush3.bf16.msra.mxu1 %v4562_v22  ;;  %v4579_v21 = vld [vmem:[#allocation16 + $0x18] ss:$12 sps:$4 sm:$0xff]   ;;  %v4580_v22 = vld [vmem:[#allocation16 + $0x1c] ss:$12 sps:$4 sm:$0xff]  }
 0x2e8   : > { %4162 = vmatprep.subr.bf16.mxu0 %v5145_v0  ;;  %4202 = vmatprep.subr.bf16.mxu1 %v5145_v0 }
 0x2eb   : > { %4163 = vmatpush3.bf16.msra.mxu0 %v4563_v23  ;;  %4203 = vmatpush3.bf16.msra.mxu1 %v4564_v24  ;;  %v4582_v23 = vld [vmem:[#allocation16 + $0x34] ss:$12 sps:$4 sm:$0xff]  }
 0x2ec   : > { %4164 = vmatprep.subr.bf16.mxu0 %v5145_v0  ;;  %4204 = vmatprep.subr.bf16.mxu1 %v5145_v0  ;;  %v4583_v24 = vld [vmem:[#allocation16 + $0x48] ss:$12 sps:$4 sm:$0xff]  }
 0x2ef   : > { %4165 = vmatpush3.bf16.msra.mxu0 %v4565_v25  ;;  %4205 = vmatpush3.bf16.msra.mxu1 %v4566_v26  ;;  %v4584_v25 = vld [vmem:[#allocation16 + $0x4c] ss:$12 sps:$4 sm:$0xff]  }
 0x2f0   : > { %4166 = vmatprep.subr.bf16.mxu0 %v5145_v0  ;;  %4206 = vmatprep.subr.bf16.mxu1 %v5145_v0  ;;  %v4585_v26 = vld [vmem:[#allocation16 + $0x60] ss:$12 sps:$4 sm:$0xff]  }
 0x2f3   : > { %4167 = vmatpush3.bf16.msra.mxu0 %v4567_v27  ;;  %4207 = vmatpush3.bf16.msra.mxu1 %v4568_v28  ;;  %v4586_v27 = vld [vmem:[#allocation16 + $0x64] ss:$12 sps:$4 sm:$0xff]  }
 0x2f4   : > { %4168 = vmatprep.subr.bf16.mxu0 %v5145_v0  ;;  %4208 = vmatprep.subr.bf16.mxu1 %v5145_v0  ;;  %v4587_v28 = vld [vmem:[#allocation16 + $0x78] ss:$12 sps:$4 sm:$0xff]  }
 0x2f7   : > { %4169 = vmatpush3.bf16.msra.mxu0 %v4569_v29  ;;  %4209 = vmatpush3.bf16.msra.mxu1 %v4570_v30  ;;  %v4588_v29 = vld [vmem:[#allocation16 + $0x7c] ss:$12 sps:$4 sm:$0xff]  }
 0x2f8   : > { %4170 = vmatprep.subr.bf16.mxu0 %v5145_v0  ;;  %4210 = vmatprep.subr.bf16.mxu1 %v5145_v0  ;;  %v4589_v30 = vld [vmem:[#allocation16 + $0x90] ss:$12 sps:$4 sm:$0xff]  }
 0x2fb   : > { %4171 = vmatpush3.bf16.msra.mxu0 %v4571_v31  ;;  %4211 = vmatpush3.bf16.msra.mxu1 %v4572_v32  ;;  %v4590_v31 = vld [vmem:[#allocation16 + $0x94] ss:$12 sps:$4 sm:$0xff]  }
 0x2fc   : > { %4172 = vmatprep.subr.bf16.mxu0 %v5145_v0  ;;  %4212 = vmatprep.subr.bf16.mxu1 %v5145_v0  ;;  %v4591_v32 = vld [vmem:[#allocation16 + $0xa8] ss:$12 sps:$4 sm:$0xff]  }
 0x2ff   : > { %4173 = vmatpush3.bf16.msra.mxu0 %v4573_v33  ;;  %4213 = vmatpush3.bf16.msra.mxu1 %v4574_v35  ;;  %v4592_v33 = vld [vmem:[#allocation16 + $0xac] ss:$12 sps:$4 sm:$0xff]  }
 0x300   : > { %4174 = vmatprep.subr.bf16.mxu0 %v5145_v0  ;;  %4214 = vmatprep.subr.bf16.mxu1 %v5145_v0  ;;  %v5898_v35 = vld [vmem:[%s804_s4] sm:$0xff]  ;;  %s5960_s4 = scalar_lea.sflag [#allocation21], %s791_s9 }
 0x303   : > { %4175 = vmatpush3.bf16.msra.mxu0 %v4575_v36  ;;  %4215 = vmatpush3.bf16.msra.mxu1 %v4576_v37  ;;  %v2320_v36 = vpack.c.bf16 %v5898_v35, %v5898_v35  ;;  %v4593_v37 = vld [vmem:[#allocation14 + $0x8] ss:$12 sps:$4 sm:$0xff]  }
 0x304   : > { %4180 = vmatprep.subr.bf16.mxu0 %v5145_v0  ;;  %4220 = vmatprep.subr.bf16.mxu1 %v5145_v0 }
 0x398   : > { %v1846_v41 = vpop.f32.mrb[8].mxu0  ;;  %v2075_v42 = vpop.f32.mrb[8].mxu1 }
 0x399   : > { %v4285_v43 = vadd.f32 %v4284_v40, %v1846_v41  ;;  %v4078_v44 = vpop.f32.mrb[9].mxu0  ;;  %v4118_v45 = vpop.f32.mrb[9].mxu1  ;;  %v4287_v54 = vadd.f32 %v4286_v53, %v2075_v42  ;;  %v4596_v40 = vld [vmem:[#allocation16 + $0x20] ss:$12 sps:$4 sm:$0xff]   ;;  %v4597_v41 = vld [vmem:[#allocation14 + $0x38] ss:$12 sps:$4 sm:$0xff]  }
 0x39a   : > { %v1849_v47 = vpop.f32.mrb[10].mxu0  ;;  %v2078_v48 = vpop.f32.mrb[10].mxu1  ;;  %v4598_v42 = vld [vmem:[#allocation16 + $0x38] ss:$12 sps:$4 sm:$0xff]   ;;  %v4600_v44 = vld [vmem:[#allocation16 + $0x50] ss:$12 sps:$4 sm:$0xff]  }
 0x39b   : > { %v3638_v49 = vmul.f32 -1.442695, %v4285_v43  ;;  %v4079_v51 = vpop.f32.mrb[11].mxu0  ;;  %v4119_v52 = vpop.f32.mrb[11].mxu1  ;;  %v3657_v34 = vmul.f32 -1.442695, %v4287_v54 }
 0x39c   : > { %v4599_v43 = vld [vmem:[#allocation14 + $0x50] ss:$12 sps:$4 sm:$0xff]   ;;  %v4601_v45 = vld [vmem:[#allocation14 + $0x68] ss:$12 sps:$4 sm:$0xff]   ;;  %v4603_v47 = vld [vmem:[#allocation14 + $0x80] ss:$12 sps:$4 sm:$0xff]  }
 0x39d   : > { %4643 = vpow2.f32 %v3638_v49  ;;  %v4604_v48 = vld [vmem:[#allocation16 + $0x80] ss:$12 sps:$4 sm:$0xff]   ;;  %v4605_v49 = vld [vmem:[#allocation14 + $0x98] ss:$12 sps:$4 sm:$0xff]   ;;  %v4607_v51 = vld [vmem:[#allocation14 + $0xb0] ss:$12 sps:$4 sm:$0xff]  }
 0x39e   : > { %4645 = vpow2.f32 %v3657_v34  ;;  %v4608_v52 = vld [vmem:[#allocation16 + $0xb0] ss:$12 sps:$4 sm:$0xff]   ;;  %v4609_v53 = vld [vmem:[#allocation17] ss:$8 sps:$4 sm:$0xff]   ;;  %v4611_v54 = vld [vmem:[#allocation17 + $0x4] ss:$8 sps:$4 sm:$0xff]  }
 0x39f   : > { %v4614_v34 = vld [vmem:[#allocation17 + $0x14] ss:$8 sps:$4 sm:$0xff]  }
 0x3a7   : > { %v4644_v55 = vpop.eup %4643 }
 0x3a8   : > { %v1856_v56 = vadd.f32 1.0, %v4644_v55  ;;  %v4646_v57 = vpop.eup %4645  ;;  %v4612_v55 = vld [vmem:[#allocation17 + $0x10] ss:$8 sps:$4 sm:$0xff]  }
 0x3a9   : > { %v2085_v59 = vadd.f32 1.0, %v4646_v57  ;;  %v4615_v57 = vld [vmem:[#allocation17 + $0x20] ss:$8 sps:$4 sm:$0xff]  }
 0x3aa   : > { %4647 = vrcp.f32 %v1856_v56  ;;  %v4617_v56 = vld [vmem:[#allocation17 + $0x24] ss:$8 sps:$4 sm:$0xff]  }
 0x3ab   : > { %4649 = vrcp.f32 %v2085_v59  ;;  %v4618_v59 = vld [vmem:[#allocation17 + $0x30] ss:$8 sps:$4 sm:$0xff]  }
 0x3b4   : > { %v4648_v4 = vpop.eup %4647 }
 0x3b5   : > { %v4650_v12 = vpop.eup %4649 }
 0x3b6   : > { %v2313_v13 = vsub.f32 1.0, %v4650_v12  ;;  %v2315_v16 = vmul.f32 %v4650_v12, %v5805_v3  ;;  %v4581_v3 = vld [vmem:[#allocation16 + $0x30] ss:$12 sps:$4 sm:$0xff]  }
 0x3b8   : > { %v2193_v61 = vpop.f32.mrb[12].mxu0  ;;  %v2304_v62 = vpop.f32.mrb[12].mxu1 }
 0x3b9   : > { %v2305_v63 = vadd.f32 %v3667_v58, %v2304_v62  ;;  %v4138_v1 = vpop.f32.mrb[13].mxu0  ;;  %v4158_v2 = vpop.f32.mrb[13].mxu1  ;;  %v2194_v7 = vadd.f32 %v3658_v60, %v2193_v61  ;;  %v4620_v58 = vld [vmem:[#allocation17 + $0x34] ss:$8 sps:$4 sm:$0xff]   ;;  %v4623_v60 = vld [vmem:[#allocation17 + $0x44] ss:$8 sps:$4 sm:$0xff]  }
 0x3ba   : > { %v2196_v5 = vpop.f32.mrb[14].mxu0  ;;  %v2307_v6 = vpop.f32.mrb[14].mxu1  ;;  %v4626_v61 = vld [vmem:[#allocation17 + $0x54] ss:$8 sps:$4 sm:$0xff]   ;;  %v4624_v62 = vld [vmem:[#allocation17 + $0x50] ss:$8 sps:$4 sm:$0xff]  }
 0x3bb   : > { %v2310_v8 = vmul.f32 %v4648_v4, %v2305_v63  ;;  %v4139_v9 = vpop.f32.mrb[15].mxu0  ;;  %v4159_v10 = vpop.f32.mrb[15].mxu1  ;;  %v5147_v63 = vmov 0   ;;  %v4629_v1 = vld [vmem:[#allocation17 + $0x64] ss:$8 sps:$4 sm:$0xff]  }
 0x3bc   : > { %v4627_v2 = vld [vmem:[#allocation17 + $0x60] ss:$8 sps:$4 sm:$0xff]   ;;  %v4632_v4 = vld [vmem:[#allocation17 + $0x74] ss:$8 sps:$4 sm:$0xff]   ;;  %v4630_v5 = vld [vmem:[#allocation17 + $0x70] ss:$8 sps:$4 sm:$0xff]  }
 0x3bd   : > { %v2311_v11 = vadd.f32 %v2310_v8, %v2194_v7  ;;  %v3676_v6 = vld [vmem:[%s6224_s25] ss:$0 sm:$0xff] }
 0x3be   : > { %v3685_v7 = vld [vmem:[%s6225_s14] ss:$0 sm:$0xff] }
 0x3bf   : > { %4651 = vtanh.f32 %v2311_v11  ;;  %v4288_v8 = vadd.f32 %v3685_v7, %v3676_v6 }
 0x3c9   : > { %v4652_v14 = vpop.eup %4651 }
 0x3ca   : > { %v2314_v15 = vmul.f32 %v4652_v14, %v2313_v13  ;;  %v3695_v14 = vld [vmem:[%s6224_s25 + $0x1] ss:$0 sm:$0xff] }
 0x3cc   : > { %v2316_v17 = vadd.f32 %v2315_v16, %v2314_v15 }
 0x3ce   : > { %v5873_v20 = vpack.c.bf16 %v2316_v17, %v2316_v17  ;;  %2317 = vst [vmem:[%s6157_s12] sm:$0xff] %v2316_v17 }
 0x3d0   : > { %4177 = vmatmul.mubr.bf16.vlgmr.msra.gmra.mrb[16].mxu0 %v5873_v20  ;;  %4217 = vmatmul.mubr.bf16.vlgmr.msra.gmra.mrb[16].mxu1 %v5873_v20 }
 0x3d1   : > { %4181 = vmatpush3.bf16.msra.mxu0 %v4577_v18  ;;  %4221 = vmatpush3.bf16.msra.mxu1 %v4578_v19  ;;  %v3704_v18 = vld [vmem:[%s6225_s14 + $0x1] ss:$0 sm:$0xff] }
 0x3d2   : > { %4182 = vmatprep.subr.bf16.mxu0 %v5145_v0  ;;  %4222 = vmatprep.subr.bf16.mxu1 %v5145_v0 }
 0x3d3   : > { %4196 = vmatprep.mubr.msk.bf16.mxu0 %vm5146_vm0, %v5145_v0  ;;  %4236 = vmatprep.mubr.msk.bf16.mxu1 %vm5146_vm0, %v5145_v0 }
 0x3d5   : > { %4183 = vmatpush3.bf16.msra.mxu0 %v4579_v21  ;;  %4223 = vmatpush3.bf16.msra.mxu1 %v4580_v22  ;;  %v4290_v21 = vadd.f32 %v3704_v18, %v3695_v14 }
 0x3d6   : > { %4184 = vmatprep.subr.bf16.mxu0 %v5145_v0  ;;  %4224 = vmatprep.subr.bf16.mxu1 %v5145_v0 }
 0x3d9   : > { %4185 = vmatpush3.bf16.msra.mxu0 %v4581_v3  ;;  %4225 = vmatpush3.bf16.msra.mxu1 %v4582_v23 }
 0x3da   : > { %4186 = vmatprep.subr.bf16.mxu0 %v5145_v0  ;;  %4226 = vmatprep.subr.bf16.mxu1 %v5145_v0 }
 0x3dd   : > { %4187 = vmatpush3.bf16.msra.mxu0 %v4583_v24  ;;  %4227 = vmatpush3.bf16.msra.mxu1 %v4584_v25 }
 0x3de   : > { %4188 = vmatprep.subr.bf16.mxu0 %v5145_v0  ;;  %4228 = vmatprep.subr.bf16.mxu1 %v5145_v0 }
 0x3e1   : > { %4189 = vmatpush3.bf16.msra.mxu0 %v4585_v26  ;;  %4229 = vmatpush3.bf16.msra.mxu1 %v4586_v27  ;;  %v3723_v26 = vld [vmem:[%s6225_s14 + $0x2] ss:$0 sm:$0xff] }
 0x3e2   : > { %4190 = vmatprep.subr.bf16.mxu0 %v5145_v0  ;;  %4230 = vmatprep.subr.bf16.mxu1 %v5145_v0 }
 0x3e5   : > { %4191 = vmatpush3.bf16.msra.mxu0 %v4587_v28  ;;  %4231 = vmatpush3.bf16.msra.mxu1 %v4588_v29  ;;  %v3714_v28 = vld [vmem:[%s6224_s25 + $0x2] ss:$0 sm:$0xff] }
 0x3e6   : > { %4192 = vmatprep.subr.bf16.mxu0 %v5145_v0  ;;  %4232 = vmatprep.subr.bf16.mxu1 %v5145_v0 }
 0x3e9   : > { %4193 = vmatpush3.bf16.msra.mxu0 %v4589_v30  ;;  %4233 = vmatpush3.bf16.msra.mxu1 %v4590_v31 }
 0x3ea   : > { %4194 = vmatprep.subr.bf16.mxu0 %v5145_v0  ;;  %4234 = vmatprep.subr.bf16.mxu1 %v5145_v0 }
 0x3ed   : > { %4195 = vmatpush3.bf16.msra.mxu0 %v4591_v32  ;;  %4235 = vmatpush3.bf16.msra.mxu1 %v4592_v33 }
 0x3ee   : > { %4240 = vmatprep.subr.bf16.mxu0 %v5145_v0  ;;  %4260 = vmatprep.subr.bf16.mxu1 %v5145_v0 }
 0x3f0   : > { %4197 = vmatmul.mubr.bf16.vlgmr.msra.gmra.mrb[16].mxu0 %v2320_v36  ;;  %4237 = vmatmul.mubr.bf16.vlgmr.msra.gmra.mrb[16].mxu1 %v2320_v36 }
 0x3f1   : > { %4241 = vmatpush3.bf16.msra.mxu0 %v4593_v37  ;;  %4261 = vmatpush3.bf16.msra.mxu1 %v4594_v38 }
 0x3f2   : > { %4242 = vmatprep.subr.bf16.mxu0 %v5145_v0  ;;  %4262 = vmatprep.subr.bf16.mxu1 %v5145_v0 }
 0x3f3   : > { %4256 = vmatprep.mubr.msk.bf16.mxu0 %vm5146_vm0, %v5145_v0  ;;  %4276 = vmatprep.mubr.msk.bf16.mxu1 %vm5146_vm0, %v5145_v0 }
 0x3f5   : > { %4243 = vmatpush3.bf16.msra.mxu0 %v4595_v39  ;;  %4263 = vmatpush3.bf16.msra.mxu1 %v4596_v40 }
 0x3f6   : > { %4244 = vmatprep.subr.bf16.mxu0 %v5145_v0  ;;  %4264 = vmatprep.subr.bf16.mxu1 %v5145_v0 }
 0x3f9   : > { %4245 = vmatpush3.bf16.msra.mxu0 %v4597_v41  ;;  %4265 = vmatpush3.bf16.msra.mxu1 %v4598_v42 }
 0x3fa   : > { %4246 = vmatprep.subr.bf16.mxu0 %v5145_v0  ;;  %4266 = vmatprep.subr.bf16.mxu1 %v5145_v0 }
 0x3fd   : > { %4247 = vmatpush3.bf16.msra.mxu0 %v4599_v43  ;;  %4267 = vmatpush3.bf16.msra.mxu1 %v4600_v44 }
 0x3fe   : > { %4248 = vmatprep.subr.bf16.mxu0 %v5145_v0  ;;  %4268 = vmatprep.subr.bf16.mxu1 %v5145_v0 }
 0x401   : > { %4249 = vmatpush3.bf16.msra.mxu0 %v4601_v45  ;;  %4269 = vmatpush3.bf16.msra.mxu1 %v4602_v46 }
 0x402   : > { %4250 = vmatprep.subr.bf16.mxu0 %v5145_v0  ;;  %4270 = vmatprep.subr.bf16.mxu1 %v5145_v0 }
 0x405   : > { %4251 = vmatpush3.bf16.msra.mxu0 %v4603_v47  ;;  %4271 = vmatpush3.bf16.msra.mxu1 %v4604_v48 }
 0x406   : > { %4252 = vmatprep.subr.bf16.mxu0 %v5145_v0  ;;  %4272 = vmatprep.subr.bf16.mxu1 %v5145_v0 }
 0x409   : > { %4253 = vmatpush3.bf16.msra.mxu0 %v4605_v49  ;;  %4273 = vmatpush3.bf16.msra.mxu1 %v4606_v50 }
 0x40a   : > { %4254 = vmatprep.subr.bf16.mxu0 %v5145_v0  ;;  %4274 = vmatprep.subr.bf16.mxu1 %v5145_v0  ;;  %v4621_v0 = vld [vmem:[#allocation17 + $0x40] ss:$8 sps:$4 sm:$0xff]  }
 0x40d   : > { %4255 = vmatpush3.bf16.msra.mxu0 %v4607_v51  ;;  %4275 = vmatpush3.bf16.msra.mxu1 %v4608_v52 }
 0x40e   : > { %3118 = vmatprep.subr.bf16.mxu0 %v4611_v54 }
 0x410   : > { %4257 = vmatmul.mubr.bf16.vlgmr.msra.gmra.mrb[20].mxu0 %v5873_v20  ;;  %4277 = vmatmul.mubr.bf16.vlgmr.msra.gmra.mrb[20].mxu1 %v2320_v36 }
 0x411   : > { %3119 = vmatpush1.bf16.msra.mxu0 %v4609_v53  ;;  %3150 = vmatprep.mubr.bf16.mxu0 %v5147_v63 }
 0x412   : > { %3120 = vmatprep.subr.bf16.mxu0 %v4614_v34 }
 0x415   : > { %3121 = vmatpush1.bf16.msra.mxu0 %v4612_v55 }
 0x416   : > { %3122 = vmatprep.subr.bf16.mxu0 %v4617_v56 }
 0x419   : > { %3123 = vmatpush1.bf16.msra.mxu0 %v4615_v57 }
 0x41a   : > { %3124 = vmatprep.subr.bf16.mxu0 %v4620_v58 }
 0x41d   : > { %3125 = vmatpush1.bf16.msra.mxu0 %v4618_v59 }
 0x41e   : > { %3126 = vmatprep.subr.bf16.mxu0 %v4623_v60 }
 0x421   : > { %3127 = vmatpush1.bf16.msra.mxu0 %v4621_v0 }
 0x422   : > { %3128 = vmatprep.subr.bf16.mxu0 %v4626_v61 }
 0x425   : > { %3129 = vmatpush1.bf16.msra.mxu0 %v4624_v62 }
 0x426   : > { %3130 = vmatprep.subr.bf16.mxu0 %v4629_v1 }
 0x429   : > { %3131 = vmatpush1.bf16.msra.mxu0 %v4627_v2 }
 0x42a   : > { %3132 = vmatprep.subr.bf16.mxu0 %v4632_v4 }
 0x42d   : > { %3133 = vmatpush1.bf16.msra.mxu0 %v4630_v5 }
 0x4c3   : > { %v2537_v9 = vpop.f32.mrb[16].mxu0  ;;  %v2766_v10 = vpop.f32.mrb[16].mxu1 }
 0x4c4   : > { %v4289_v11 = vadd.f32 %v4288_v8, %v2537_v9  ;;  %v4198_v12 = vpop.f32.mrb[17].mxu0  ;;  %v4238_v13 = vpop.f32.mrb[17].mxu1  ;;  %v4291_v22 = vadd.f32 %v4290_v21, %v2766_v10 }
 0x4c5   : > { %v2540_v15 = vpop.f32.mrb[18].mxu0  ;;  %v2769_v16 = vpop.f32.mrb[18].mxu1 }
 0x4c6   : > { %v3694_v17 = vmul.f32 -1.442695, %v4289_v11  ;;  %v4199_v19 = vpop.f32.mrb[19].mxu0  ;;  %v4239_v20 = vpop.f32.mrb[19].mxu1  ;;  %v3713_v3 = vmul.f32 -1.442695, %v4291_v22 }
 0x4c8   : > { %4653 = vpow2.f32 %v3694_v17 }
 0x4c9   : > { %4655 = vpow2.f32 %v3713_v3 }
 0x4d2   : > { %v4654_v23 = vpop.eup %4653 }
 0x4d3   : > { %v2547_v24 = vadd.f32 1.0, %v4654_v23  ;;  %v4656_v25 = vpop.eup %4655 }
 0x4d4   : > { %v2776_v27 = vadd.f32 1.0, %v4656_v25 }
 0x4d5   : > { %4657 = vrcp.f32 %v2547_v24 }
 0x4d6   : > { %4659 = vrcp.f32 %v2776_v27 }
 0x4df   : > { %v4658_v36 = vpop.eup %4657 }
 0x4e0   : > { %v4660_v44 = vpop.eup %4659 }
 0x4e1   : > { %v3004_v45 = vsub.f32 1.0, %v4660_v44  ;;  %v3006_v48 = vmul.f32 %v4660_v44, %v5898_v35 }
 0x4e3   : > { %v2884_v29 = vpop.f32.mrb[20].mxu0  ;;  %v2995_v30 = vpop.f32.mrb[20].mxu1 }
 0x4e4   : > { %v2996_v31 = vadd.f32 %v3723_v26, %v2995_v30  ;;  %v4258_v32 = vpop.f32.mrb[21].mxu0  ;;  %v4278_v33 = vpop.f32.mrb[21].mxu1  ;;  %v2885_v39 = vadd.f32 %v3714_v28, %v2884_v29 }
 0x4e5   : > { %v2887_v37 = vpop.f32.mrb[22].mxu0  ;;  %v2998_v38 = vpop.f32.mrb[22].mxu1 }
 0x4e6   : > { %v3001_v40 = vmul.f32 %v4658_v36, %v2996_v31  ;;  %v4259_v41 = vpop.f32.mrb[23].mxu0  ;;  %v4279_v42 = vpop.f32.mrb[23].mxu1 }
 0x4e8   : > { %v3002_v43 = vadd.f32 %v3001_v40, %v2885_v39 }
 0x4ea   : > { %4661 = vtanh.f32 %v3002_v43 }
 0x4f4   : > { %v4662_v46 = vpop.eup %4661 }
 0x4f5   : > { %v3005_v47 = vmul.f32 %v4662_v46, %v3004_v45 }
 0x4f7   : > { %v3007_v49 = vadd.f32 %v3006_v48, %v3005_v47 }
 0x4f9   : > { %v3009_v50 = vpack.c.bf16 %v3007_v49, %v3007_v49  ;;  %3008 = vst [vmem:[%s6156_s27] sm:$0xff] %v3007_v49  ;;  %s4955_s27 = sshll.u32 %s5148_s20, 4  ;;  %s4956_s27 = int_to_ptr.vmem [resolvable:$false] %s4955_s27 }
 0x4fa   : > { %s4957_s12 = scalar_lea.vmem %s4956_s27, 256  ;;  %p4958_p1 = scmp.lt.s32.totalorder %s3209_s3, %s4956_s27 }
 0x4fb   : > { %3151 = vmatmul.mubr.bf16.vlgmr.msra.gmra.mrb[24].mxu0 %v3009_v50  ;;  %p4959_p6 = scmp.lt.s32.totalorder %s4957_s12, %s4951_s19 }
 0x4fd   : > { %p4960_p13 = por %p4959_p6, %p4958_p1 }
 0x4ff   : > { %p4961_p5 = pnand %p4960_p13, %p4954_p10 }
 0x501   : > { %4964 = shalt.err (!%p4961_p5)
}
 0x502   : > { %s4965_s23 = scalar_lea.hbm %s5954_s30, 128  ;;  %s4969_s20 = scalar_lea.hbm %s6227_s1, 256 }
 0x503   : > { %p4966_p9 = scmp.ne.s32.totalorder %s5954_s30, %s4965_s23  ;;  %p4970_p2 = scmp.lt.u32.totalorder %s5954_s30, %s6227_s1 }
 0x504   : > { %p4971_p0 = scmp.lt.u32.totalorder %s4969_s20, %s4965_s23  ;;  %p4973_p4 = scmp.lt.u32.totalorder %s4965_s23, %s5954_s30 }
 0x505   : > { %p4967_p11 = pnand %p4966_p9, %p6228_p7 }
 0x506   : > { %p4972_p8 = por %p4971_p0, %p4970_p2 }
 0x507   : > { %p4968_p3 = pneg %p4967_p11 }
 0x508   : > { %p4974_p12 = por %p4973_p4, %p4972_p8 }
 0x50a   : > { %p4975_p10 = pnand %p4974_p12, %p4968_p3 }
 0x50c   : > { %4978 = shalt.err (!%p4975_p10)
}
 0x50d   : > { %4351 = dma.vmem_to_hbm [thread:$0]  (%p6228_p7), %s3209_s3, 128, %s5954_s30, %s5960_s4  }
 0x50e   : > { %s6229_s19 = sld [smem:[#allocation58_spill]]  ;;  %s6230_s16 = scalar_lea.vmem [#allocation22], %s5625_s0 }
 0x50f   : > { %s3221_s20 = sshll.u32 %s6230_s16, 4  ;;  %s5149_s7 = smov [#allocation22]   ;;  %s3222_s20 = int_to_ptr.vmem [resolvable:$true] %s3221_s20 }
 0x510   : > { %s4979_s23 = scalar_lea.vmem %s3222_s20, 128  ;;  %s4983_s27 = sshll.u32 %s5149_s7, 4  ;;  %s4984_s27 = int_to_ptr.vmem [resolvable:$false] %s4983_s27 }
 0x511   : > { %p4980_p1 = scmp.ne.s32.totalorder %s3222_s20, %s4979_s23  ;;  %s4985_s1 = scalar_lea.vmem %s4984_s27, 256 }
 0x512   : > { %p4986_p5 = scmp.lt.s32.totalorder %s3222_s20, %s4984_s27  ;;  %p4987_p9 = scmp.lt.s32.totalorder %s4985_s1, %s4979_s23 }
 0x513   : > { %p4981_p6 = pnand %p4980_p1, %p6228_p7 }
 0x514   : > { %s5984_s9 = scalar_lea.hbm %s6229_s19, %s5948_s21  ;;  %p4988_p11 = por %p4987_p9, %p4986_p5 }
 0x515   : > { %p4982_p13 = pneg %p4981_p6 }
 0x517   : > { %p4989_p3 = pnand %p4988_p11, %p4982_p13 }
 0x519   : > { %4992 = shalt.err (!%p4989_p3)
}
 0x51a   : > { %s4993_s30 = scalar_lea.hbm %s5984_s9, 128  ;;  %s4997_s13 = scalar_lea.hbm %s6229_s19, 256 }
 0x51b   : > { %p4994_p2 = scmp.ne.s32.totalorder %s5984_s9, %s4993_s30  ;;  %p4998_p4 = scmp.lt.u32.totalorder %s5984_s9, %s6229_s19 }
 0x51c   : > { %p4999_p12 = scmp.lt.u32.totalorder %s4997_s13, %s4993_s30  ;;  %p5001_p1 = scmp.lt.u32.totalorder %s4993_s30, %s5984_s9 }
 0x51d   : > { %p4995_p0 = pnand %p4994_p2, %p6228_p7 }
 0x51e   : > { %p5000_p10 = por %p4999_p12, %p4998_p4 }
 0x51f   : > { %p4996_p8 = pneg %p4995_p0 }
 0x520   : > { %p5002_p6 = por %p5001_p1, %p5000_p10 }
 0x522   : > { %p5003_p13 = pnand %p5002_p6, %p4996_p8 }
 0x524   : > { %5006 = shalt.err (!%p5003_p13)
}
 0x525   : > { %4352 = dma.vmem_to_hbm [thread:$0]  (%p6228_p7), %s3222_s20, 128, %s5984_s9, %s5960_s4  }
 0x526   : > { %s6231_s27 = sld [smem:[#allocation59_spill]]  ;;  %s6232_s12 = scalar_lea.vmem [#allocation23], %s5625_s0 }
 0x527   : > { %s3234_s13 = sshll.u32 %s6232_s12, 4  ;;  %s3182_s30 = scalar_lea.sflag [#allocation24], %s5622_s2  ;;  %s3235_s13 = int_to_ptr.vmem [resolvable:$true] %s3234_s13 }
 0x528   : > { %s5007_s16 = scalar_lea.vmem %s3235_s13, 128  ;;  %s5150_s7 = smov [#allocation23]  }
 0x529   : > { %p5008_p5 = scmp.ne.s32.totalorder %s3235_s13, %s5007_s16  ;;  %s5011_s6 = sshll.u32 %s5150_s7, 4  ;;  %s5012_s6 = int_to_ptr.vmem [resolvable:$false] %s5011_s6 }
 0x52a   : > { %s5013_s8 = scalar_lea.vmem %s5012_s6, 256  ;;  %p5014_p3 = scmp.lt.s32.totalorder %s3235_s13, %s5012_s6 }
 0x52b   : > { %p5009_p9 = pnand %p5008_p5, %p6228_p7  ;;  %p5015_p2 = scmp.lt.s32.totalorder %s5013_s8, %s5007_s16 }
 0x52c   : > { %s6010_s3 = scalar_lea.hbm %s6231_s27, %s5948_s21 }
 0x52d   : > { %p5010_p11 = pneg %p5009_p9  ;;  %p5016_p0 = por %p5015_p2, %p5014_p3 }
 0x52f   : > { %p5017_p8 = pnand %p5016_p0, %p5010_p11 }
 0x531   : > { %5020 = shalt.err (!%p5017_p8)
}
 0x532   : > { %s5021_s4 = scalar_lea.hbm %s6010_s3, 128  ;;  %s5025_s1 = scalar_lea.hbm %s6231_s27, 256 }
 0x533   : > { %p5022_p4 = scmp.ne.s32.totalorder %s6010_s3, %s5021_s4  ;;  %p5026_p1 = scmp.lt.u32.totalorder %s6010_s3, %s6231_s27 }
 0x534   : > { %p5027_p6 = scmp.lt.u32.totalorder %s5025_s1, %s5021_s4  ;;  %p5029_p5 = scmp.lt.u32.totalorder %s5021_s4, %s6010_s3 }
 0x535   : > { %p5023_p12 = pnand %p5022_p4, %p6228_p7 }
 0x536   : > { %p5028_p13 = por %p5027_p6, %p5026_p1 }
 0x537   : > { %p5024_p10 = pneg %p5023_p12 }
 0x538   : > { %p5030_p9 = por %p5029_p5, %p5028_p13 }
 0x53a   : > { %p5031_p11 = pnand %p5030_p9, %p5024_p10 }
 0x53c   : > { %5034 = shalt.err (!%p5031_p11)
}
 0x53d   : > { %4353 = dma.vmem_to_hbm [thread:$0]  (%p6228_p7), %s3235_s13, 128, %s6010_s3, %s3182_s30   ;;  %v3028_v35 = vlaneseq }
 0x53e   : > { %s6233_s16 = sld [smem:[#allocation55_spill]]  ;;  %s6234_s3 = sshll.u32 %s5674_s26, 3 }
 0x53f   : > { %v3029_v51 = vshrl.u32 %v3028_v35, 7  ;;  %s6235_s7 = sld [smem:[#allocation41_spill]]  ;;  %s904_s9 = scalar_lea.vmem [#allocation19], %s5625_s0 }
 0x540   : > { %s3195_s20 = sshll.u32 %s904_s9, 4  ;;  %s6236_s6 = sld [smem:[#allocation56_spill]]  ;;  %s6047_s20 = int_to_ptr.vmem [resolvable:$true] %s3195_s20 }
 0x541   : > { %v3034_v52 = vsub.s32 1, %v3029_v51  ;;  %v3030_v60 = vsub.s32 0, %v3029_v51  ;;  %s3167_s26 = scalar_lea.sflag [#allocation4], %s5622_s2  ;;  %s5035_s12 = scalar_lea.vmem %s6047_s20, 128 }
 0x542   : > { %p5036_p3 = scmp.ne.s32.totalorder %s6047_s20, %s5035_s12  ;;  %s5151_s0 = smov [#allocation19]  }
 0x544   : > { %v3026_v53 = vld [vmem:[%s6233_s16] sm:$0x3]  ;;  %p5037_p2 = pnand %p5036_p3, %p6228_p7  ;;  %s5039_s16 = sshll.u32 %s5151_s0, 4  ;;  %s5040_s16 = int_to_ptr.vmem [resolvable:$false] %s5039_s16 }
 0x545   : > { %v3035_v54 = vrot.slane %v3026_v53, %v3034_v52  ;;  %s933_s4 = scalar_lea.vmem %s6235_s7, %s6234_s3  ;;  %v3031_v61 = vrot.slane %v3026_v53, %v3030_v60  ;;  %s5041_s3 = scalar_lea.vmem %s5040_s16, 256 }
 0x546   : > { %v3162_v62 = vld [vmem:[%s933_s4] sm:$0xff]  ;;  %s6045_s8 = scalar_lea.hbm %s6236_s6, %s5948_s21  ;;  %p5038_p0 = pneg %p5037_p2 }
 0x547   : > { %p5042_p8 = scmp.lt.s32.totalorder %s6047_s20, %s5040_s16  ;;  %p5043_p4 = scmp.lt.s32.totalorder %s5041_s3, %s5035_s12 }
 0x549   : > { %p5044_p12 = por %p5043_p4, %p5042_p8 }
 0x54b   : > { %p5045_p10 = pnand %p5044_p12, %p5038_p0 }
 0x5ce   : > { %v3152_v34 = vpop.f32.mrb[24].mxu0 }
 0x5cf   : > { %v3154_v55 = vpop.f32.mrb[25].mxu0  ;;  %v3153_v1 = vadd.f32 %v3152_v34, %v3031_v61 }
 0x5d0   : > { %v3155_v56 = vadd.f32 %v3154_v55, %v3035_v54  ;;  %v3156_v57 = vpop.f32.mrb[26].mxu0 }
 0x5d1   : > { %v3157_v58 = vpop.f32.mrb[27].mxu0 }
 0x5d2   : > { %v3159_v59 = vmul.f32 0.5, %v3155_v56 }
 0x5d4   : > { %v3160_v0 = vmul.f32 1.442695, %v3159_v59 }
 0x5d6   : > { %4663 = vpow2.f32 %v3160_v0 }
 0x5e0   : > { %v4664_v63 = vpop.eup %4663 }
 0x5e1   : > { %v3163_v2 = vmul.f32 %v4664_v63, %v3162_v62 }
 0x5e3   : > { %v3164_v4 = vadd.f32 %v3163_v2, %v3153_v1 }
 0x5e5   : > { %3165 = vst [vmem:[%s904_s9] sm:$0xff] %v3164_v4 }
 0x5e6   : > { %5048 = shalt.err (!%p5045_p10)
}
 0x5e7   : > { %s5049_s2 = scalar_lea.hbm %s6045_s8, 128  ;;  %s5053_s30 = scalar_lea.hbm %s6236_s6, 256 }
 0x5e8   : > { %p5050_p1 = scmp.ne.s32.totalorder %s6045_s8, %s5049_s2  ;;  %p5054_p5 = scmp.lt.u32.totalorder %s6045_s8, %s6236_s6 }
 0x5e9   : > { %p5055_p9 = scmp.lt.u32.totalorder %s5053_s30, %s5049_s2  ;;  %p5057_p3 = scmp.lt.u32.totalorder %s5049_s2, %s6045_s8 }
 0x5ea   : > { %p5051_p6 = pnand %p5050_p1, %p6228_p7 }
 0x5eb   : > { %p5056_p11 = por %p5055_p9, %p5054_p5 }
 0x5ec   : > { %p5052_p13 = pneg %p5051_p6 }
 0x5ed   : > { %p5058_p2 = por %p5057_p3, %p5056_p11 }
 0x5ef   : > { %p5059_p0 = pnand %p5058_p2, %p5052_p13 }
 0x5f1   : > { %5062 = shalt.err (!%p5059_p0)
}
 0x5f2   : > { %4350 = dma.vmem_to_hbm [thread:$0]  (%p6228_p7), %s6047_s20, 128, %s6045_s8, %s3167_s26  }
 0x5f3 PF: > { %s6237_s9 = sld [smem:[#allocation34_spill]]  ;;  %s6238_s1 = sld [smem:[#allocation39_spill]] }
 0x5f4   : > { %s6239_s23 = sld [smem:[#allocation35_spill]] }
 0x5f9   : > { %s3246_s12 = sand.u32 1, %s6237_s9   ;;  %p6240_p8 = scmp.ne.s32.totalorder %s6238_s1, 0 }
 0x5fa   : > { %p6241_p4 = scmp.ge.s32.totalorder %s6239_s23, 2  ;;  %s3247_s0 = scalar_lea.sflag [#allocation4], %s3246_s12 }
 0x5fc   : > { %p4391_p12 = pnand %p6241_p4, %p6240_p8 }
 0x5fe   : > { %5104 = dma.done.wait (!%p4391_p12), %s3247_s0, 128  }
 0x5ff   : > { %5106 = vsyncadd (!%p4391_p12), %s3247_s0, 4294967168  ;;  %s6242_s16 = sadd.s32 4294967294, %s6239_s23  }
 0x600   : > { %s3255_s3 = sand.u32 1, %s6242_s16  }
 0x601   : > { %s3256_s2 = scalar_lea.sflag [#allocation21], %s3255_s3 }
 0x602   : > { %5108 = dma.done.wait (!%p4391_p12), %s3256_s2, 256  }
 0x603   : > { %5110 = vsyncadd (!%p4391_p12), %s3256_s2, 4294967040  ;;  %s3274_s5 = scalar_lea.sflag [#allocation24], %s3246_s12 }
 0x604   : > { %5112 = dma.done.wait (!%p4391_p12), %s3274_s5, 128  }
 0x605   : > { %5114 = vsyncadd (!%p4391_p12), %s3274_s5, 4294967168  ;;  %s6243_s30 = sld [smem:[#allocation36_spill]]  ;;  %s6244_s20 = sld [smem:[#allocation37_spill]] }
 0x606   : > { %s6245_s3 = smov %s5121_s28  ;;  %s6246_s28 = smov %s5125_s29 }
 0x60b   : > { %p49_p7 = scmp.ge.s32.totalorder %s6243_s30, 4   ;;  %s6247_s29 = smov %s6244_s20 }
 0x60d   :  { %51 = sbr.rel (!%p49_p7) target bundleno = 36 (0x24), region = 248 }
 0x614   :  { %3279 = vsyncpa [#allocation3], 1 }
 0x615   :  { %3281 = vsyncpa [#allocation3 + $0x1], 1 }
 0x616   :  { %3282 = vsyncpa [#allocation6], 1 }
 0x617   :  { %3284 = vsyncpa [#allocation6 + $0x1], 1 }
 0x618   :  { %3285 = vsyncpa [#allocation9], 1 }
 0x619   :  { %3286 = vsyncpa [#allocation12], 1 }
 0x61a   :  { %3287 = vsyncpa [#allocation15], 1 }
 0x61b   :  { %3288 = vsyncpa [#allocation18], 1 }
 0x61c   :  { %3289 = vsyncpa [#allocation4], 1 }
 0x61d   :  { %3291 = vsyncpa [#allocation4 + $0x1], 1 }
 0x61e   :  { %3292 = vsyncpa [#allocation21], 1 }
 0x61f   :  { %3294 = vsyncpa [#allocation21 + $0x1], 1 }
 0x620   :  { %3295 = vsyncpa [#allocation24], 1 }
 0x621   :  { %3297 = vsyncpa [#allocation24 + $0x1], 1 }

</bundles_post_ra>
